<compile_context>
chip_gen: v6e
topology: v6e:2x2x1
jax: 0.10.0
libtpu: 0.0.40
codegen_flags: <defaults>
</compile_context>

<pallas_src>
import functools
import math

import jax
import jax.numpy as jnp
from jax.experimental import pallas as pl
from jax.experimental.pallas import tpu as pltpu

NEG_INF = -1e10


# ----------------------------- tiling helpers -----------------------------

def _round_up(x, m):
    return (x + m - 1) // m * m


def _pick_tile(dim, target, mult):
    """Largest t <= target that is a multiple of `mult` and divides `dim`;
    falls back to the full dimension (full blocks are always legal)."""
    if dim <= target:
        return dim
    t = (target // mult) * mult
    while t >= mult:
        if dim % t == 0:
            return t
        t -= mult
    return dim


def _row_tile_target(width, budget_bytes=12 << 20, lo=128, hi=512):
    """Row tile sized so the row-scaled VMEM (x/out/acc, double-buffered) stays
    within `budget_bytes`; the <=8 MiB of weight tiles ride on top, keeping
    each kernel under the 32 MiB scoped-VMEM default on v5e/v6e/v7x."""
    t = budget_bytes // (24 * max(int(width), 1))
    return int(max(lo, min(hi, t)))


def _prep_rows(m, target):
    """Padded row count (divisible by the row tile) and the row tile itself."""
    mp = _round_up(m, 8)
    tm = _pick_tile(mp, target, 8)
    if tm == mp and mp > 2 * target:
        tm = target
        mp = _round_up(m, tm)
    return mp, tm


def _pad_rows(x, mp):
    m = x.shape[0]
    if m == mp:
        return x
    return jnp.pad(x, ((0, mp - m),) + ((0, 0),) * (x.ndim - 1))


def _pick_nb_tile(nb, block_len, target_rows=256):
    """Number of attention blocks processed per grid step (divisor of nb).
    Up to ~256 query rows per step amortizes the 2-block K/V halo read while
    keeping the f32 score temporaries small enough for v7x's 64 MiB VMEM."""
    best = 1
    for t in range(1, nb + 1):
        if nb % t == 0 and t * block_len <= max(target_rows, block_len):
            best = t
    return best


# ----------------------------- Pallas kernels -----------------------------

def _rms_matmul_kernel(x_ref, g_ref, w_ref, o_ref, xn_ref, *, eps):
    """Fused T5 RMSNorm + bf16 matmul.  The normed bf16 activations are cached
    in VMEM and recomputed only on the first column tile."""
    @pl.when(pl.program_id(1) == 0)
    def _():
        x = x_ref[...].astype(jnp.float32)
        var = jnp.mean(x * x, axis=-1, keepdims=True)
        xn_ref[...] = (x * jax.lax.rsqrt(var + eps) * g_ref[...]).astype(jnp.bfloat16)

    y = jnp.dot(xn_ref[...], w_ref[...], preferred_element_type=jnp.float32)
    o_ref[...] = y.astype(o_ref.dtype)


def rms_linear(x, gamma, w, *, eps, out_dtype=jnp.float32,
               tm_target=None, tn_target=512):
    """out = rmsnorm(x; gamma) @ w.  x: (M, D) f32, w: (D, N) bf16."""
    M, D = x.shape
    N = w.shape[1]
    tm_target = tm_target or _row_tile_target(D)
    Mp, tm = _prep_rows(M, tm_target)
    tn = _pick_tile(N, tn_target, 128)
    xp = _pad_rows(x, Mp)
    out = pl.pallas_call(
        functools.partial(_rms_matmul_kernel, eps=eps),
        out_shape=jax.ShapeDtypeStruct((Mp, N), out_dtype),
        grid=(Mp // tm, N // tn),
        in_specs=[
            pl.BlockSpec((tm, D), lambda i, j: (i, 0)),
            pl.BlockSpec((1, D), lambda i, j: (0, 0)),
            pl.BlockSpec((D, tn), lambda i, j: (0, j)),
        ],
        out_specs=pl.BlockSpec((tm, tn), lambda i, j: (i, j)),
        scratch_shapes=[pltpu.VMEM((tm, D), jnp.bfloat16)],
        compiler_params=pltpu.CompilerParams(
            dimension_semantics=("parallel", "arbitrary")),
    )(xp, gamma.reshape(1, D), w)
    return out[:M] if Mp != M else out


def _matmul_res_kernel(x_ref, w_ref, r_ref, o_ref):
    y = jnp.dot(x_ref[...], w_ref[...], preferred_element_type=jnp.float32)
    o_ref[...] = (r_ref[...] + y).astype(o_ref.dtype)


def linear_residual(x, w, res, *, tm_target=None, tn_target=512):
    """out = res + x @ w.  x: (M, K) bf16, w: (K, N) bf16, res: (M, N) f32."""
    M, K = x.shape
    N = w.shape[1]
    tm_target = tm_target or _row_tile_target(max(K, N))
    Mp, tm = _prep_rows(M, tm_target)
    tn = _pick_tile(N, tn_target, 128)
    xp = _pad_rows(x, Mp)
    rp = _pad_rows(res, Mp)
    out = pl.pallas_call(
        _matmul_res_kernel,
        out_shape=jax.ShapeDtypeStruct((Mp, N), jnp.float32),
        grid=(Mp // tm, N // tn),
        in_specs=[
            pl.BlockSpec((tm, K), lambda i, j: (i, 0)),
            pl.BlockSpec((K, tn), lambda i, j: (0, j)),
            pl.BlockSpec((tm, tn), lambda i, j: (i, j)),
        ],
        out_specs=pl.BlockSpec((tm, tn), lambda i, j: (i, j)),
        compiler_params=pltpu.CompilerParams(
            dimension_semantics=("parallel", "parallel")),
    )(xp, w, rp)
    return out[:M] if Mp != M else out


def _ff_kernel(x_ref, g_ref, wi_ref, wo_ref, o_ref, acc_ref, xn_ref, *, eps):
    """Fused RMSNorm -> wi -> ReLU -> wo_ff -> +residual, tiled over d_ff with
    a float32 VMEM accumulator (the (M, d_ff) intermediate never hits HBM)."""
    f = pl.program_id(1)

    @pl.when(f == 0)
    def _():
        x = x_ref[...].astype(jnp.float32)
        var = jnp.mean(x * x, axis=-1, keepdims=True)
        xn_ref[...] = (x * jax.lax.rsqrt(var + eps) * g_ref[...]).astype(jnp.bfloat16)
        acc_ref[...] = jnp.zeros_like(acc_ref)

    h1 = jnp.dot(xn_ref[...], wi_ref[...], preferred_element_type=jnp.float32)
    h1 = jnp.maximum(h1, 0.0).astype(jnp.bfloat16)
    acc_ref[...] += jnp.dot(h1, wo_ref[...], preferred_element_type=jnp.float32)

    @pl.when(f == pl.num_programs(1) - 1)
    def _():
        o_ref[...] = x_ref[...] + acc_ref[...]   # residual add fused in


def ff_block(x, gamma, wi, wo, *, eps, tm_target=None, tf_target=512):
    M, D = x.shape
    F = wi.shape[1]
    tm_target = tm_target or _row_tile_target(D)
    Mp, tm = _prep_rows(M, tm_target)
    tf = _pick_tile(F, tf_target, 128)
    xp = _pad_rows(x, Mp)
    out = pl.pallas_call(
        functools.partial(_ff_kernel, eps=eps),
        out_shape=jax.ShapeDtypeStruct((Mp, D), jnp.float32),
        grid=(Mp // tm, F // tf),
        in_specs=[
            pl.BlockSpec((tm, D), lambda i, f: (i, 0)),
            pl.BlockSpec((1, D), lambda i, f: (0, 0)),
            pl.BlockSpec((D, tf), lambda i, f: (0, f)),
            pl.BlockSpec((tf, D), lambda i, f: (f, 0)),
        ],
        out_specs=pl.BlockSpec((tm, D), lambda i, f: (i, 0)),
        scratch_shapes=[
            pltpu.VMEM((tm, D), jnp.float32),
            pltpu.VMEM((tm, D), jnp.bfloat16),
        ],
        compiler_params=pltpu.CompilerParams(
            dimension_semantics=("parallel", "arbitrary")),
    )(xp, gamma.reshape(1, D), wi, wo)
    return out[:M] if Mp != M else out


def _rmsnorm_kernel(x_ref, g_ref, o_ref, *, eps):
    x = x_ref[...].astype(jnp.float32)
    var = jnp.mean(x * x, axis=-1, keepdims=True)
    o_ref[...] = x * jax.lax.rsqrt(var + eps) * g_ref[...]


def rmsnorm(x, gamma, eps, *, tm_target=None):
    M, D = x.shape
    tm_target = tm_target or _row_tile_target(D)
    Mp, tm = _prep_rows(M, tm_target)
    xp = _pad_rows(x, Mp)
    out = pl.pallas_call(
        functools.partial(_rmsnorm_kernel, eps=eps),
        out_shape=jax.ShapeDtypeStruct((Mp, D), jnp.float32),
        grid=(Mp // tm,),
        in_specs=[
            pl.BlockSpec((tm, D), lambda i: (i, 0)),
            pl.BlockSpec((1, D), lambda i: (0, 0)),
        ],
        out_specs=pl.BlockSpec((tm, D), lambda i: (i, 0)),
        compiler_params=pltpu.CompilerParams(dimension_semantics=("parallel",)),
    )(xp, gamma.reshape(1, D))
    return out[:M] if Mp != M else out


def _local_attn_kernel(len_ref, q_ref, k_hbm, v_hbm, bias_ref, o_ref,
                       kbuf, vbuf, sem, *, block_len, nb_tile, seq_len,
                       n_heads, d_head):
    b = pl.program_id(0)
    n = pl.program_id(1)
    n_last = pl.num_programs(1) - 1
    L = block_len
    nb = nb_tile
    H = n_heads
    Dh = d_head
    HD = H * Dh
    M = nb * L           # query rows handled this step
    W = (nb + 2) * L     # key/value window length (core blocks + 2 halos)

    # ---- manual DMA of the K/V window: nb core blocks + conditional halos ---
    def core_copy(src, dst, s):
        return pltpu.make_async_copy(src.at[b, pl.ds(n * nb, nb)],
                                     dst.at[pl.ds(1, nb)], sem.at[s])

    def left_copy(src, dst, s):
        return pltpu.make_async_copy(src.at[b, pl.ds(n * nb - 1, 1)],
                                     dst.at[pl.ds(0, 1)], sem.at[s])

    def right_copy(src, dst, s):
        return pltpu.make_async_copy(src.at[b, pl.ds(n * nb + nb, 1)],
                                     dst.at[pl.ds(nb + 1, 1)], sem.at[s])

    core_copy(k_hbm, kbuf, 0).start()
    core_copy(v_hbm, vbuf, 1).start()

    @pl.when(n > 0)
    def _():
        left_copy(k_hbm, kbuf, 2).start()
        left_copy(v_hbm, vbuf, 3).start()

    @pl.when(n == 0)       # no left neighbour: zero the halo slot (it is masked)
    def _():
        kbuf[0, :, :] = jnp.zeros((L, HD), dtype=kbuf.dtype)
        vbuf[0, :, :] = jnp.zeros((L, HD), dtype=vbuf.dtype)

    @pl.when(n < n_last)
    def _():
        right_copy(k_hbm, kbuf, 4).start()
        right_copy(v_hbm, vbuf, 5).start()

    @pl.when(n == n_last)  # no right neighbour: zero the halo slot (masked)
    def _():
        kbuf[nb + 1, :, :] = jnp.zeros((L, HD), dtype=kbuf.dtype)
        vbuf[nb + 1, :, :] = jnp.zeros((L, HD), dtype=vbuf.dtype)

    # ---- padding mask built on the VPU while the DMAs are in flight --------
    # The static locality / 3-block-window term is already folded into the
    # resident bias table, so only length-dependent masking is done here.
    length = jnp.minimum(len_ref[b], seq_len)
    r = jax.lax.broadcasted_iota(jnp.int32, (M, 1), 0)
    c = jax.lax.broadcasted_iota(jnp.int32, (1, W), 1)
    q_pos = n * nb * L + r                     # (M, 1)
    k_pos = (n * nb - 1) * L + c               # (1, W)
    valid = (q_pos < length) & (k_pos >= 0) & (k_pos < length)
    add_mask = jnp.where(valid, 0.0, NEG_INF)  # (M, W) f32

    core_copy(k_hbm, kbuf, 0).wait()
    core_copy(v_hbm, vbuf, 1).wait()

    @pl.when(n > 0)
    def _():
        left_copy(k_hbm, kbuf, 2).wait()
        left_copy(v_hbm, vbuf, 3).wait()

    @pl.when(n < n_last)
    def _():
        right_copy(k_hbm, kbuf, 4).wait()
        right_copy(v_hbm, vbuf, 5).wait()

    q2 = q_ref[0].reshape(M, HD)               # (M, HD)  bf16, lane-dense
    k2 = kbuf[...].reshape(W, HD)              # (W, HD)  bf16
    v2 = vbuf[...].reshape(W, HD)

    outs = []
    for h in range(H):
        sl = slice(h * Dh, (h + 1) * Dh)
        # Query blocks packed along M; T5-style attention has no 1/sqrt(d).
        s = jax.lax.dot_general(q2[:, sl], k2[:, sl],
                                (((1,), (1,)), ((), ())),
                                preferred_element_type=jnp.float32)   # (M, W)
        s = s + bias_ref[h] + add_mask
        s = s - jnp.max(s, axis=-1, keepdims=True)
        p = jnp.exp(s)
        inv = pl.reciprocal(jnp.sum(p, axis=-1, keepdims=True), approx=True)
        pv = jax.lax.dot_general(p.astype(jnp.bfloat16), v2[:, sl],
                                 (((1,), (0,)), ((), ())),
                                 preferred_element_type=jnp.float32)  # (M, Dh)
        outs.append(pv * inv)                  # normalize the small (M, Dh) side

    out = jnp.concatenate(outs, axis=-1)       # (M, H*Dh) -- lane-dense
    o_ref[0] = out.reshape(nb, L, HD).astype(o_ref.dtype)   # single dense store


def local_attention(lengths, q_b, k_b, v_b, bias, *, block_len, seq_len, nb_tile):
    """q_b/k_b/v_b: (B, NB, L, H*Dh) bf16 (lane-dense blocked layout);
    bias: (H, nb_tile*L, (nb_tile+2)*L) f32 with locality already folded in;
    lengths: (B,) int32 (scalar-prefetched)."""
    B, NB, L, HD = q_b.shape
    H = bias.shape[0]
    Dh = HD // H
    M = nb_tile * L
    W = (nb_tile + 2) * L
    kernel = functools.partial(
        _local_attn_kernel, block_len=L, nb_tile=nb_tile,
        seq_len=seq_len, n_heads=H, d_head=Dh)
    return pl.pallas_call(
        kernel,
        out_shape=jax.ShapeDtypeStruct((B, NB, L, HD), jnp.bfloat16),
        grid_spec=pltpu.PrefetchScalarGridSpec(
            num_scalar_prefetch=1,
            grid=(B, NB // nb_tile),
            in_specs=[
                pl.BlockSpec((1, nb_tile, L, HD),
                             lambda b, n, lens: (b, n, 0, 0)),
                pl.BlockSpec(memory_space=pl.ANY),   # K cache, manual DMA
                pl.BlockSpec(memory_space=pl.ANY),   # V cache, manual DMA
                pl.BlockSpec((H, M, W), lambda b, n, lens: (0, 0, 0)),
            ],
            out_specs=pl.BlockSpec((1, nb_tile, L, HD),
                                   lambda b, n, lens: (b, n, 0, 0)),
            scratch_shapes=[
                pltpu.VMEM((nb_tile + 2, L, HD), jnp.bfloat16),
                pltpu.VMEM((nb_tile + 2, L, HD), jnp.bfloat16),
                pltpu.SemaphoreType.DMA((6,)),
            ],
        ),
        compiler_params=pltpu.CompilerParams(
            dimension_semantics=("parallel", "parallel")),
    )(lengths, q_b, k_b, v_b, bias)


# ----------------------------- JAX glue (LongT5 plumbing) -----------------------------

def _relative_position_bucket(rel_pos, num_buckets, max_distance):
    # bidirectional (encoder)
    num_buckets = num_buckets // 2
    rel_buckets = (rel_pos > 0).astype(jnp.int32) * num_buckets
    rel_pos = jnp.abs(rel_pos)
    max_exact = max(num_buckets // 2, 1)
    is_small = rel_pos < max_exact
    rel_large = max_exact + (
        jnp.log(jnp.maximum(rel_pos, 1).astype(jnp.float32) / max_exact)
        / math.log(max_distance / max_exact)
        * (num_buckets - max_exact)
    ).astype(jnp.int32)
    rel_large = jnp.minimum(rel_large, num_buckets - 1)
    return rel_buckets + jnp.where(is_small, rel_pos, rel_large)


def _compute_full_bias(rel_emb, block_len, nb_tile, num_buckets, max_distance):
    """Relative position bias in the 'full window frame' of one attention grid
    step: rows = nb_tile query blocks, cols = nb_tile + 2 key blocks.  The
    static locality mask (|rel| < block_len, which also implies the HF 3-block
    window) is folded in here so the kernel only adds the padding mask."""
    L = block_len
    rows = nb_tile * L
    cols = (nb_tile + 2) * L
    r = jnp.arange(rows, dtype=jnp.int32)
    c = jnp.arange(cols, dtype=jnp.int32)
    rel = c[None, :] - (r[:, None] + L)                   # mem_pos - ctx_pos
    buckets = _relative_position_bucket(rel, num_buckets, max_distance)
    values = rel_emb[buckets]                             # (rows, cols, H)
    bias = jnp.transpose(values, (2, 0, 1))               # (H, rows, cols)
    local = (jnp.abs(rel) < L)[None]
    return jnp.where(local, bias, NEG_INF).astype(jnp.float32)


# ----------------------------- model definition -----------------------------

class Config:
    def __init__(self, d_model, nhead, n_layers, dim_feedforward, window_size):
        self.d_model = d_model
        self.num_heads = nhead
        self.num_layers = n_layers
        self.d_ff = dim_feedforward
        self.d_kv = 64  # LongT5Config default; the PyTorch wrapper never overrides it
        self.local_radius = window_size
        self.block_len = window_size + 1
        # NOTE: mirrors the reference module verbatim, including its operator
        # precedence (`window_size + 1 // 4` == window_size).
        self.relative_attention_num_buckets = max(4, window_size + 1 // 4)
        self.relative_attention_max_distance = window_size + 1
        self.layer_norm_epsilon = 1e-6  # LongT5Config default (wrapper's eps unused)


def init_params(key, cfg):
    inner = cfg.num_heads * cfg.d_kv

    def dense(k, shape):
        return 0.05 * jax.random.normal(k, shape, dtype=jnp.float32)

    layers = []
    for _ in range(cfg.num_layers):
        key, *ks = jax.random.split(key, 7)
        layers.append(dict(
            ln_attn=jnp.ones((cfg.d_model,), jnp.float32),
            wq=dense(ks[0], (cfg.d_model, inner)),
            wk=dense(ks[1], (cfg.d_model, inner)),
            wv=dense(ks[2], (cfg.d_model, inner)),
            wo=dense(ks[3], (inner, cfg.d_model)),
            ln_ff=jnp.ones((cfg.d_model,), jnp.float32),
            wi=dense(ks[4], (cfg.d_model, cfg.d_ff)),
            wo_ff=dense(ks[5], (cfg.d_ff, cfg.d_model)),
        ))
    key, k_rel = jax.random.split(key)
    return dict(
        layers=layers,
        rel_bias=dense(k_rel, (cfg.relative_attention_num_buckets, cfg.num_heads)),
        final_ln=jnp.ones((cfg.d_model,), jnp.float32),
    )


def longt5_forward(params, inputs, lengths, cfg):
    B, S, D = inputs.shape
    H, Dh = cfg.num_heads, cfg.d_kv
    inner = H * Dh
    L = cfg.block_len
    NB = -(-S // L)
    S_pad = NB * L
    nb_tile = _pick_nb_tile(NB, L)
    eps = cfg.layer_norm_epsilon
    lengths = lengths.astype(jnp.int32)

    # (H, nb*L, (nb+2)*L) bias with the static locality mask folded in; kept
    # VMEM-resident inside the attention kernel.
    bias = _compute_full_bias(
        params["rel_bias"], L, nb_tile,
        cfg.relative_attention_num_buckets,
        cfg.relative_attention_max_distance)

    # Pre-cast weights to bf16 (MXU inputs) and fuse the Q/K/V projections.
    layers = []
    for lp in params["layers"]:
        layers.append(dict(
            ln_attn=lp["ln_attn"],
            wqkv=jnp.concatenate([lp["wq"], lp["wk"], lp["wv"]],
                                 axis=1).astype(jnp.bfloat16),
            wo=lp["wo"].astype(jnp.bfloat16),
            ln_ff=lp["ln_ff"],
            wi=lp["wi"].astype(jnp.bfloat16),
            wo_ff=lp["wo_ff"].astype(jnp.bfloat16),
        ))

    def to_blocks(x2d):
        """(B*S, inner) -> (B, NB, L, inner): reshape + seq pad only, no
        transposes and no phantom K/V pad (halos handled inside the kernel)."""
        x = x2d.reshape(B, S, inner)
        if S_pad != S:
            x = jnp.pad(x, ((0, 0), (0, S_pad - S), (0, 0)))
        return x.reshape(B, NB, L, inner)

    # TODO(synk): dropout layers are identity here (inference/eval-mode semantics).
    h = inputs.astype(jnp.float32).reshape(B * S, D)
    for lp in layers:
        # --- LongT5LayerLocalSelfAttention (RMSNorm fused into the QKV matmul) ---
        qkv = rms_linear(h, lp["ln_attn"], lp["wqkv"], eps=eps,
                         out_dtype=jnp.bfloat16)              # (B*S, 3*inner) bf16
        q_b = to_blocks(qkv[:, :inner])
        k_b = to_blocks(qkv[:, inner:2 * inner])
        v_b = to_blocks(qkv[:, 2 * inner:])

        attn = local_attention(lengths, q_b, k_b, v_b, bias,
                               block_len=L, seq_len=S, nb_tile=nb_tile)
        attn = attn.reshape(B, S_pad, inner)[:, :S].reshape(B * S, inner)
        h = linear_residual(attn, lp["wo"], h)                # h + attn @ Wo

        # --- LongT5LayerFF (RMSNorm -> wi -> ReLU -> wo_ff -> +residual, fused) ---
        h = ff_block(h, lp["ln_ff"], lp["wi"], lp["wo_ff"], eps=eps)

    h = rmsnorm(h, params["final_ln"], eps)
    return h.reshape(B, S, D)  # last_hidden_state


# ----------------------------- main -----------------------------

if __name__ == "__main__":
    cfg = Config(d_model=32, nhead=2, n_layers=2, dim_feedforward=64, window_size=7)

    key = jax.random.PRNGKey(0)
    k_param, k_in = jax.random.split(key)
    params = init_params(k_param, cfg)

    B, S = 2, 16
    inputs = jax.random.normal(k_in, (B, S, cfg.d_model), dtype=jnp.float32)
    lengths = jnp.array([16, 11], dtype=jnp.int32)

    fwd = jax.jit(functools.partial(longt5_forward, cfg=cfg))
    out = fwd(params, inputs, lengths)
    jax.block_until_ready(out)
    assert out.shape == (B, S, cfg.d_model)
    assert jnp.all(jnp.isfinite(out))
    print("KERNEL_OK")
</pallas_src>

<mosaic_0001>
module attributes {stable_mosaic.version = 11 : i64} {
  func.func @_rms_matmul_kernel(%arg0: i32, %arg1: i32, %arg2: memref<32x32xf32, #tpu.memory_space<vmem>>, %arg3: memref<1x32xf32, #tpu.memory_space<vmem>>, %arg4: memref<32x384xbf16, #tpu.memory_space<vmem>>, %arg5: memref<32x384xbf16, #tpu.memory_space<vmem>>, %arg6: memref<32x32xbf16, #tpu.memory_space<vmem>>) attributes {dimension_semantics = [#tpu.dimension_semantics<parallel>, #tpu.dimension_semantics<arbitrary>], iteration_bounds = array<i64: 1, 1>, scalar_prefetch = 0 : i64, scratch_operands = 1 : i64, tpu.core_type = #tpu.core_type<tc>, window_params = [{transform_indices = @transform_0, window_bounds = array<i64: 32, 32>}, {pipeline_mode = #tpu.pipeline_mode<synchronous>, transform_indices = @transform_1, window_bounds = array<i64: 1, 32>}, {transform_indices = @transform_2, window_bounds = array<i64: 32, 384>}, {transform_indices = @transform_3, window_bounds = array<i64: 32, 384>}]} {
    %c0_i32 = arith.constant 0 : i32
    %0 = arith.cmpi eq, %arg1, %c0_i32 : i32
    %1 = arith.extui %0 : i1 to i32
    %c0_i32_0 = arith.constant 0 : i32
    %2 = arith.cmpi ne, %1, %c0_i32_0 : i32
    scf.if %2 {
      %c0_6 = arith.constant 0 : index
      %c0_7 = arith.constant 0 : index
      %8 = vector.load %arg2[%c0_6, %c0_7] : memref<32x32xf32, #tpu.memory_space<vmem>>, vector<32x32xf32>
      %9 = arith.mulf %8, %8 : vector<32x32xf32>
      %cst_8 = arith.constant dense<0.000000e+00> : vector<32xf32>
      %10 = vector.multi_reduction <add>, %9, %cst_8 [1] : vector<32x32xf32> to vector<32xf32>
      %11 = vector.shape_cast %10 : vector<32xf32> to vector<32x1xf32>
      %cst_9 = arith.constant 3.200000e+01 : f32
      %12 = vector.broadcast %cst_9 : f32 to vector<32x1xf32>
      %13 = arith.divf %11, %12 : vector<32x1xf32>
      %cst_10 = arith.constant 9.99999997E-7 : f32
      %14 = vector.broadcast %cst_10 : f32 to vector<32x1xf32>
      %15 = arith.addf %13, %14 : vector<32x1xf32>
      %16 = math.rsqrt %15 : vector<32x1xf32>
      %17 = vector.broadcast %16 : vector<32x1xf32> to vector<32x32xf32>
      %18 = arith.mulf %8, %17 : vector<32x32xf32>
      %c0_11 = arith.constant 0 : index
      %c0_12 = arith.constant 0 : index
      %19 = vector.load %arg3[%c0_11, %c0_12] : memref<1x32xf32, #tpu.memory_space<vmem>>, vector<1x32xf32>
      %20 = vector.broadcast %19 : vector<1x32xf32> to vector<32x32xf32>
      %21 = arith.mulf %18, %20 : vector<32x32xf32>
      %22 = arith.truncf %21 : vector<32x32xf32> to vector<32x32xbf16>
      %c0_13 = arith.constant 0 : index
      %c0_14 = arith.constant 0 : index
      %23 = vector.load %arg6[%c0_13, %c0_14] : memref<32x32xbf16, #tpu.memory_space<vmem>>, vector<32x32xbf16>
      tpu.vector_store %arg6[%c0_13, %c0_14], %22 {strides = array<i32>} : memref<32x32xbf16, #tpu.memory_space<vmem>>, vector<32x32xbf16>,
    } else {
    }
    %c0 = arith.constant 0 : index
    %c0_1 = arith.constant 0 : index
    %3 = vector.load %arg6[%c0, %c0_1] : memref<32x32xbf16, #tpu.memory_space<vmem>>, vector<32x32xbf16>
    %c0_2 = arith.constant 0 : index
    %c0_3 = arith.constant 0 : index
    %4 = vector.load %arg4[%c0_2, %c0_3] : memref<32x384xbf16, #tpu.memory_space<vmem>>, vector<32x384xbf16>
    %cst = arith.constant dense<0.000000e+00> : vector<32x384xf32>
    %5 = tpu.matmul %3, %4, %cst {dimension_numbers = #tpu.dot_dimension_numbers<[1], [0], [0], [1], [0, 0, 1, 1], [], []>} : vector<32x32xbf16>, vector<32x384xbf16>, vector<32x384xf32> -> vector<32x384xf32>
    %6 = arith.truncf %5 : vector<32x384xf32> to vector<32x384xbf16>
    %c0_4 = arith.constant 0 : index
    %c0_5 = arith.constant 0 : index
    %7 = vector.load %arg5[%c0_4, %c0_5] : memref<32x384xbf16, #tpu.memory_space<vmem>>, vector<32x384xbf16>
    tpu.vector_store %arg5[%c0_4, %c0_5], %6 {strides = array<i32>} : memref<32x384xbf16, #tpu.memory_space<vmem>>, vector<32x384xbf16>,
    return
  }
  func.func @transform_0(%arg0: i32, %arg1: i32) -> (i32, i32) {
    %c0_i32 = arith.constant 0 : i32
    %c0_i32_0 = arith.constant 0 : i32
    return %arg0, %c0_i32 : i32, i32
  }
  func.func @transform_1(%arg0: i32, %arg1: i32) -> (i32, i32) {
    %c0_i32 = arith.constant 0 : i32
    %c0_i32_0 = arith.constant 0 : i32
    %c0_i32_1 = arith.constant 0 : i32
    return %c0_i32, %c0_i32_0 : i32, i32
  }
  func.func @transform_2(%arg0: i32, %arg1: i32) -> (i32, i32) {
    %c0_i32 = arith.constant 0 : i32
    %c0_i32_0 = arith.constant 0 : i32
    return %c0_i32, %arg1 : i32, i32
  }
  func.func @transform_3(%arg0: i32, %arg1: i32) -> (i32, i32) {
    %c0_i32 = arith.constant 0 : i32
    return %arg0, %arg1 : i32, i32
  }
}

module attributes {stable_mosaic.version = 11 : i64} {
  func.func @_matmul_res_kernel(%arg0: i32, %arg1: i32, %arg2: memref<32x128xbf16, #tpu.memory_space<vmem>>, %arg3: memref<128x32xbf16, #tpu.memory_space<vmem>>, %arg4: memref<32x32xf32, #tpu.memory_space<vmem>>, %arg5: memref<32x32xf32, #tpu.memory_space<vmem>>) attributes {dimension_semantics = [#tpu.dimension_semantics<parallel>, #tpu.dimension_semantics<parallel>], iteration_bounds = array<i64: 1, 1>, scalar_prefetch = 0 : i64, scratch_operands = 0 : i64, tpu.core_type = #tpu.core_type<tc>, window_params = [{transform_indices = @transform_0, window_bounds = array<i64: 32, 128>}, {transform_indices = @transform_1, window_bounds = array<i64: 128, 32>}, {transform_indices = @transform_2, window_bounds = array<i64: 32, 32>}, {transform_indices = @transform_3, window_bounds = array<i64: 32, 32>}]} {
    %c0 = arith.constant 0 : index
    %c0_0 = arith.constant 0 : index
    %0 = vector.load %arg2[%c0, %c0_0] : memref<32x128xbf16, #tpu.memory_space<vmem>>, vector<32x128xbf16>
    %c0_1 = arith.constant 0 : index
    %c0_2 = arith.constant 0 : index
    %1 = vector.load %arg3[%c0_1, %c0_2] : memref<128x32xbf16, #tpu.memory_space<vmem>>, vector<128x32xbf16>
    %cst = arith.constant dense<0.000000e+00> : vector<32x32xf32>
    %2 = tpu.matmul %0, %1, %cst {dimension_numbers = #tpu.dot_dimension_numbers<[1], [0], [0], [1], [0, 0, 1, 1], [], []>} : vector<32x128xbf16>, vector<128x32xbf16>, vector<32x32xf32> -> vector<32x32xf32>
    %c0_3 = arith.constant 0 : index
    %c0_4 = arith.constant 0 : index
    %3 = vector.load %arg4[%c0_3, %c0_4] : memref<32x32xf32, #tpu.memory_space<vmem>>, vector<32x32xf32>
    %4 = arith.addf %3, %2 : vector<32x32xf32>
    %c0_5 = arith.constant 0 : index
    %c0_6 = arith.constant 0 : index
    %5 = vector.load %arg5[%c0_5, %c0_6] : memref<32x32xf32, #tpu.memory_space<vmem>>, vector<32x32xf32>
    tpu.vector_store %arg5[%c0_5, %c0_6], %4 {strides = array<i32>} : memref<32x32xf32, #tpu.memory_space<vmem>>, vector<32x32xf32>,
    return
  }
  func.func @transform_0(%arg0: i32, %arg1: i32) -> (i32, i32) {
    %c0_i32 = arith.constant 0 : i32
    %c0_i32_0 = arith.constant 0 : i32
    return %arg0, %c0_i32 : i32, i32
  }
  func.func @transform_1(%arg0: i32, %arg1: i32) -> (i32, i32) {
    %c0_i32 = arith.constant 0 : i32
    %c0_i32_0 = arith.constant 0 : i32
    return %c0_i32, %arg1 : i32, i32
  }
  func.func @transform_2(%arg0: i32, %arg1: i32) -> (i32, i32) {
    %c0_i32 = arith.constant 0 : i32
    return %arg0, %arg1 : i32, i32
  }
  func.func @transform_3(%arg0: i32, %arg1: i32) -> (i32, i32) {
    %c0_i32 = arith.constant 0 : i32
    return %arg0, %arg1 : i32, i32
  }
}

module attributes {stable_mosaic.version = 11 : i64} {
  func.func @_local_attn_kernel(%arg0: i32, %arg1: i32, %arg2: memref<2xi32, #tpu.memory_space<smem>>, %arg3: memref<1x2x8x128xbf16, #tpu.memory_space<vmem>>, %arg4: memref<2x2x8x128xbf16, #tpu.memory_space<any>>, %arg5: memref<2x2x8x128xbf16, #tpu.memory_space<any>>, %arg6: memref<2x16x32xf32, #tpu.memory_space<vmem>>, %arg7: memref<1x2x8x128xbf16, #tpu.memory_space<vmem>>, %arg8: memref<4x8x128xbf16, #tpu.memory_space<vmem>>, %arg9: memref<4x8x128xbf16, #tpu.memory_space<vmem>>, %arg10: memref<6x!tpu.dma_semaphore, #tpu.memory_space<semaphore_mem>>) attributes {dimension_semantics = [#tpu.dimension_semantics<parallel>, #tpu.dimension_semantics<parallel>], iteration_bounds = array<i64: 2, 1>, scalar_prefetch = 1 : i64, scratch_operands = 3 : i64, tpu.core_type = #tpu.core_type<tc>, window_params = [{transform_indices = @transform_0, window_bounds = array<i64: 1, 2, 8, 128>}, {}, {}, {pipeline_mode = #tpu.pipeline_mode<synchronous>, transform_indices = @transform_3, window_bounds = array<i64: 2, 16, 32>}, {transform_indices = @transform_4, window_bounds = array<i64: 1, 2, 8, 128>}]} {
    %c2_i32 = arith.constant 2 : i32
    %0 = arith.muli %arg1, %c2_i32 : i32
    %c0_i32 = arith.constant 0 : i32
    %c0_i32_0 = arith.constant 0 : i32
    %c0_i32_1 = arith.constant 0 : i32
    %1 = tpu.memref_slice %arg4[%arg0, %0, %c0_i32_0, %c0_i32_1] : memref<2x2x8x128xbf16, #tpu.memory_space<any>> -> memref<1x2x8x128xbf16, #tpu.memory_space<any>>
    %2 = tpu.memref_squeeze %1 : memref<1x2x8x128xbf16, #tpu.memory_space<any>> -> memref<2x8x128xbf16, #tpu.memory_space<any>>
    %c1_i32 = arith.constant 1 : i32
    %c0_i32_2 = arith.constant 0 : i32
    %c0_i32_3 = arith.constant 0 : i32
    %3 = tpu.memref_slice %arg8[%c1_i32, %c0_i32_2, %c0_i32_3] : memref<4x8x128xbf16, #tpu.memory_space<vmem>> -> memref<2x8x128xbf16, #tpu.memory_space<vmem>>
    %4 = tpu.memref_slice %arg10[%c0_i32] : memref<6x!tpu.dma_semaphore, #tpu.memory_space<semaphore_mem>> -> memref<1x!tpu.dma_semaphore, #tpu.memory_space<semaphore_mem>>
    %5 = tpu.memref_squeeze %4 : memref<1x!tpu.dma_semaphore, #tpu.memory_space<semaphore_mem>> -> memref<!tpu.dma_semaphore, #tpu.memory_space<semaphore_mem>>
    tpu.enqueue_dma source(%2 : memref<2x8x128xbf16, #tpu.memory_space<any>>) target(%3 : memref<2x8x128xbf16, #tpu.memory_space<vmem>>) target_semaphore(%5 : memref<!tpu.dma_semaphore, #tpu.memory_space<semaphore_mem>>)
    %c2_i32_4 = arith.constant 2 : i32
    %6 = arith.muli %arg1, %c2_i32_4 : i32
    %c1_i32_5 = arith.constant 1 : i32
    %c0_i32_6 = arith.constant 0 : i32
    %c0_i32_7 = arith.constant 0 : i32
    %7 = tpu.memref_slice %arg5[%arg0, %6, %c0_i32_6, %c0_i32_7] : memref<2x2x8x128xbf16, #tpu.memory_space<any>> -> memref<1x2x8x128xbf16, #tpu.memory_space<any>>
    %8 = tpu.memref_squeeze %7 : memref<1x2x8x128xbf16, #tpu.memory_space<any>> -> memref<2x8x128xbf16, #tpu.memory_space<any>>
    %c1_i32_8 = arith.constant 1 : i32
    %c0_i32_9 = arith.constant 0 : i32
    %c0_i32_10 = arith.constant 0 : i32
    %9 = tpu.memref_slice %arg9[%c1_i32_8, %c0_i32_9, %c0_i32_10] : memref<4x8x128xbf16, #tpu.memory_space<vmem>> -> memref<2x8x128xbf16, #tpu.memory_space<vmem>>
    %10 = tpu.memref_slice %arg10[%c1_i32_5] : memref<6x!tpu.dma_semaphore, #tpu.memory_space<semaphore_mem>> -> memref<1x!tpu.dma_semaphore, #tpu.memory_space<semaphore_mem>>
    %11 = tpu.memref_squeeze %10 : memref<1x!tpu.dma_semaphore, #tpu.memory_space<semaphore_mem>> -> memref<!tpu.dma_semaphore, #tpu.memory_space<semaphore_mem>>
    tpu.enqueue_dma source(%8 : memref<2x8x128xbf16, #tpu.memory_space<any>>) target(%9 : memref<2x8x128xbf16, #tpu.memory_space<vmem>>) target_semaphore(%11 : memref<!tpu.dma_semaphore, #tpu.memory_space<semaphore_mem>>)
    %c0_i32_11 = arith.constant 0 : i32
    %12 = arith.cmpi sgt, %arg1, %c0_i32_11 : i32
    %13 = arith.extui %12 : i1 to i32
    %c0_i32_12 = arith.constant 0 : i32
    %14 = arith.cmpi ne, %13, %c0_i32_12 : i32
    scf.if %14 {
      %c2_i32_69 = arith.constant 2 : i32
      %123 = arith.muli %arg1, %c2_i32_69 : i32
      %c1_i32_70 = arith.constant 1 : i32
      %124 = arith.subi %123, %c1_i32_70 : i32
      %c2_i32_71 = arith.constant 2 : i32
      %c0_i32_72 = arith.constant 0 : i32
      %c0_i32_73 = arith.constant 0 : i32
      %125 = tpu.memref_slice %arg4[%arg0, %124, %c0_i32_72, %c0_i32_73] : memref<2x2x8x128xbf16, #tpu.memory_space<any>> -> memref<1x1x8x128xbf16, #tpu.memory_space<any>>
      %126 = tpu.memref_squeeze %125 : memref<1x1x8x128xbf16, #tpu.memory_space<any>> -> memref<1x8x128xbf16, #tpu.memory_space<any>>
      %c0_i32_74 = arith.constant 0 : i32
      %c0_i32_75 = arith.constant 0 : i32
      %c0_i32_76 = arith.constant 0 : i32
      %127 = tpu.memref_slice %arg8[%c0_i32_74, %c0_i32_75, %c0_i32_76] : memref<4x8x128xbf16, #tpu.memory_space<vmem>> -> memref<1x8x128xbf16, #tpu.memory_space<vmem>>
      %128 = tpu.memref_slice %arg10[%c2_i32_71] : memref<6x!tpu.dma_semaphore, #tpu.memory_space<semaphore_mem>> -> memref<1x!tpu.dma_semaphore, #tpu.memory_space<semaphore_mem>>
      %129 = tpu.memref_squeeze %128 : memref<1x!tpu.dma_semaphore, #tpu.memory_space<semaphore_mem>> -> memref<!tpu.dma_semaphore, #tpu.memory_space<semaphore_mem>>
      tpu.enqueue_dma source(%126 : memref<1x8x128xbf16, #tpu.memory_space<any>>) target(%127 : memref<1x8x128xbf16, #tpu.memory_space<vmem>>) target_semaphore(%129 : memref<!tpu.dma_semaphore, #tpu.memory_space<semaphore_mem>>)
      %c2_i32_77 = arith.constant 2 : i32
      %130 = arith.muli %arg1, %c2_i32_77 : i32
      %c1_i32_78 = arith.constant 1 : i32
      %131 = arith.subi %130, %c1_i32_78 : i32
      %c3_i32 = arith.constant 3 : i32
      %c0_i32_79 = arith.constant 0 : i32
      %c0_i32_80 = arith.constant 0 : i32
      %132 = tpu.memref_slice %arg5[%arg0, %131, %c0_i32_79, %c0_i32_80] : memref<2x2x8x128xbf16, #tpu.memory_space<any>> -> memref<1x1x8x128xbf16, #tpu.memory_space<any>>
      %133 = tpu.memref_squeeze %132 : memref<1x1x8x128xbf16, #tpu.memory_space<any>> -> memref<1x8x128xbf16, #tpu.memory_space<any>>
      %c0_i32_81 = arith.constant 0 : i32
      %c0_i32_82 = arith.constant 0 : i32
      %c0_i32_83 = arith.constant 0 : i32
      %134 = tpu.memref_slice %arg9[%c0_i32_81, %c0_i32_82, %c0_i32_83] : memref<4x8x128xbf16, #tpu.memory_space<vmem>> -> memref<1x8x128xbf16, #tpu.memory_space<vmem>>
      %135 = tpu.memref_slice %arg10[%c3_i32] : memref<6x!tpu.dma_semaphore, #tpu.memory_space<semaphore_mem>> -> memref<1x!tpu.dma_semaphore, #tpu.memory_space<semaphore_mem>>
      %136 = tpu.memref_squeeze %135 : memref<1x!tpu.dma_semaphore, #tpu.memory_space<semaphore_mem>> -> memref<!tpu.dma_semaphore, #tpu.memory_space<semaphore_mem>>
      tpu.enqueue_dma source(%133 : memref<1x8x128xbf16, #tpu.memory_space<any>>) target(%134 : memref<1x8x128xbf16, #tpu.memory_space<vmem>>) target_semaphore(%136 : memref<!tpu.dma_semaphore, #tpu.memory_space<semaphore_mem>>)
    } else {
    }
    %c0_i32_13 = arith.constant 0 : i32
    %15 = arith.cmpi eq, %arg1, %c0_i32_13 : i32
    %16 = arith.extui %15 : i1 to i32
    %c0_i32_14 = arith.constant 0 : i32
    %17 = arith.cmpi ne, %16, %c0_i32_14 : i32
    scf.if %17 {
      %cst_69 = arith.constant 0.000000e+00 : bf16
      %123 = vector.broadcast %cst_69 : bf16 to vector<8x128xbf16>
      %c0_70 = arith.constant 0 : index
      %c0_71 = arith.constant 0 : index
      %c0_72 = arith.constant 0 : index
      %124 = vector.load %arg8[%c0_70, %c0_71, %c0_72] : memref<4x8x128xbf16, #tpu.memory_space<vmem>>, vector<1x8x128xbf16>
      %125 = vector.shape_cast %124 : vector<1x8x128xbf16> to vector<8x128xbf16>
      %126 = vector.shape_cast %123 : vector<8x128xbf16> to vector<1x8x128xbf16>
      tpu.vector_store %arg8[%c0_70, %c0_71, %c0_72], %126 {strides = array<i32>} : memref<4x8x128xbf16, #tpu.memory_space<vmem>>, vector<1x8x128xbf16>,
      %cst_73 = arith.constant 0.000000e+00 : bf16
      %127 = vector.broadcast %cst_73 : bf16 to vector<8x128xbf16>
      %c0_74 = arith.constant 0 : index
      %c0_75 = arith.constant 0 : index
      %c0_76 = arith.constant 0 : index
      %128 = vector.load %arg9[%c0_74, %c0_75, %c0_76] : memref<4x8x128xbf16, #tpu.memory_space<vmem>>, vector<1x8x128xbf16>
      %129 = vector.shape_cast %128 : vector<1x8x128xbf16> to vector<8x128xbf16>
      %130 = vector.shape_cast %127 : vector<8x128xbf16> to vector<1x8x128xbf16>
      tpu.vector_store %arg9[%c0_74, %c0_75, %c0_76], %130 {strides = array<i32>} : memref<4x8x128xbf16, #tpu.memory_space<vmem>>, vector<1x8x128xbf16>,
    } else {
    }
    %c0_i32_15 = arith.constant 0 : i32
    %18 = arith.cmpi slt, %arg1, %c0_i32_15 : i32
    %19 = arith.extui %18 : i1 to i32
    %c0_i32_16 = arith.constant 0 : i32
    %20 = arith.cmpi ne, %19, %c0_i32_16 : i32
    scf.if %20 {
      %c2_i32_69 = arith.constant 2 : i32
      %123 = arith.muli %arg1, %c2_i32_69 : i32
      %c2_i32_70 = arith.constant 2 : i32
      %124 = arith.addi %123, %c2_i32_70 : i32
      %c4_i32 = arith.constant 4 : i32
      %c0_i32_71 = arith.constant 0 : i32
      %c0_i32_72 = arith.constant 0 : i32
      %125 = tpu.memref_slice %arg4[%arg0, %124, %c0_i32_71, %c0_i32_72] : memref<2x2x8x128xbf16, #tpu.memory_space<any>> -> memref<1x1x8x128xbf16, #tpu.memory_space<any>>
      %126 = tpu.memref_squeeze %125 : memref<1x1x8x128xbf16, #tpu.memory_space<any>> -> memref<1x8x128xbf16, #tpu.memory_space<any>>
      %c3_i32 = arith.constant 3 : i32
      %c0_i32_73 = arith.constant 0 : i32
      %c0_i32_74 = arith.constant 0 : i32
      %127 = tpu.memref_slice %arg8[%c3_i32, %c0_i32_73, %c0_i32_74] : memref<4x8x128xbf16, #tpu.memory_space<vmem>> -> memref<1x8x128xbf16, #tpu.memory_space<vmem>>
      %128 = tpu.memref_slice %arg10[%c4_i32] : memref<6x!tpu.dma_semaphore, #tpu.memory_space<semaphore_mem>> -> memref<1x!tpu.dma_semaphore, #tpu.memory_space<semaphore_mem>>
      %129 = tpu.memref_squeeze %128 : memref<1x!tpu.dma_semaphore, #tpu.memory_space<semaphore_mem>> -> memref<!tpu.dma_semaphore, #tpu.memory_space<semaphore_mem>>
      tpu.enqueue_dma source(%126 : memref<1x8x128xbf16, #tpu.memory_space<any>>) target(%127 : memref<1x8x128xbf16, #tpu.memory_space<vmem>>) target_semaphore(%129 : memref<!tpu.dma_semaphore, #tpu.memory_space<semaphore_mem>>)
      %c2_i32_75 = arith.constant 2 : i32
      %130 = arith.muli %arg1, %c2_i32_75 : i32
      %c2_i32_76 = arith.constant 2 : i32
      %131 = arith.addi %130, %c2_i32_76 : i32
      %c5_i32 = arith.constant 5 : i32
      %c0_i32_77 = arith.constant 0 : i32
      %c0_i32_78 = arith.constant 0 : i32
      %132 = tpu.memref_slice %arg5[%arg0, %131, %c0_i32_77, %c0_i32_78] : memref<2x2x8x128xbf16, #tpu.memory_space<any>> -> memref<1x1x8x128xbf16, #tpu.memory_space<any>>
      %133 = tpu.memref_squeeze %132 : memref<1x1x8x128xbf16, #tpu.memory_space<any>> -> memref<1x8x128xbf16, #tpu.memory_space<any>>
      %c3_i32_79 = arith.constant 3 : i32
      %c0_i32_80 = arith.constant 0 : i32
      %c0_i32_81 = arith.constant 0 : i32
      %134 = tpu.memref_slice %arg9[%c3_i32_79, %c0_i32_80, %c0_i32_81] : memref<4x8x128xbf16, #tpu.memory_space<vmem>> -> memref<1x8x128xbf16, #tpu.memory_space<vmem>>
      %135 = tpu.memref_slice %arg10[%c5_i32] : memref<6x!tpu.dma_semaphore, #tpu.memory_space<semaphore_mem>> -> memref<1x!tpu.dma_semaphore, #tpu.memory_space<semaphore_mem>>
      %136 = tpu.memref_squeeze %135 : memref<1x!tpu.dma_semaphore, #tpu.memory_space<semaphore_mem>> -> memref<!tpu.dma_semaphore, #tpu.memory_space<semaphore_mem>>
      tpu.enqueue_dma source(%133 : memref<1x8x128xbf16, #tpu.memory_space<any>>) target(%134 : memref<1x8x128xbf16, #tpu.memory_space<vmem>>) target_semaphore(%136 : memref<!tpu.dma_semaphore, #tpu.memory_space<semaphore_mem>>)
    } else {
    }
    %c0_i32_17 = arith.constant 0 : i32
    %21 = arith.cmpi eq, %arg1, %c0_i32_17 : i32
    %22 = arith.extui %21 : i1 to i32
    %c0_i32_18 = arith.constant 0 : i32
    %23 = arith.cmpi ne, %22, %c0_i32_18 : i32
    scf.if %23 {
      %cst_69 = arith.constant 0.000000e+00 : bf16
      %123 = vector.broadcast %cst_69 : bf16 to vector<8x128xbf16>
      %c3 = arith.constant 3 : index
      %c0_70 = arith.constant 0 : index
      %c0_71 = arith.constant 0 : index
      %124 = vector.load %arg8[%c3, %c0_70, %c0_71] : memref<4x8x128xbf16, #tpu.memory_space<vmem>>, vector<1x8x128xbf16>
      %125 = vector.shape_cast %124 : vector<1x8x128xbf16> to vector<8x128xbf16>
      %126 = vector.shape_cast %123 : vector<8x128xbf16> to vector<1x8x128xbf16>
      tpu.vector_store %arg8[%c3, %c0_70, %c0_71], %126 {strides = array<i32>} : memref<4x8x128xbf16, #tpu.memory_space<vmem>>, vector<1x8x128xbf16>,
      %cst_72 = arith.constant 0.000000e+00 : bf16
      %127 = vector.broadcast %cst_72 : bf16 to vector<8x128xbf16>
      %c3_73 = arith.constant 3 : index
      %c0_74 = arith.constant 0 : index
      %c0_75 = arith.constant 0 : index
      %128 = vector.load %arg9[%c3_73, %c0_74, %c0_75] : memref<4x8x128xbf16, #tpu.memory_space<vmem>>, vector<1x8x128xbf16>
      %129 = vector.shape_cast %128 : vector<1x8x128xbf16> to vector<8x128xbf16>
      %130 = vector.shape_cast %127 : vector<8x128xbf16> to vector<1x8x128xbf16>
      tpu.vector_store %arg9[%c3_73, %c0_74, %c0_75], %130 {strides = array<i32>} : memref<4x8x128xbf16, #tpu.memory_space<vmem>>, vector<1x8x128xbf16>,
    } else {
    }
    %24 = arith.index_cast %arg0 : i32 to index
    %25 = memref.load %arg2[%24] : memref<2xi32, #tpu.memory_space<smem>>
    %c16_i32 = arith.constant 16 : i32
    %26 = arith.minsi %25, %c16_i32 : i32
    %27 = tpu.iota {dimensions = array<i32: 0>} : vector<16x1xi32>
    %28 = tpu.iota {dimensions = array<i32: 1>} : vector<1x32xi32>
    %c2_i32_19 = arith.constant 2 : i32
    %29 = arith.muli %arg1, %c2_i32_19 : i32
    %c8_i32 = arith.constant 8 : i32
    %30 = arith.muli %29, %c8_i32 : i32
    %31 = vector.broadcast %30 : i32 to vector<16x1xi32>
    %32 = arith.addi %31, %27 : vector<16x1xi32>
    %c2_i32_20 = arith.constant 2 : i32
    %33 = arith.muli %arg1, %c2_i32_20 : i32
    %c1_i32_21 = arith.constant 1 : i32
    %34 = arith.subi %33, %c1_i32_21 : i32
    %c8_i32_22 = arith.constant 8 : i32
    %35 = arith.muli %34, %c8_i32_22 : i32
    %36 = vector.broadcast %35 : i32 to vector<1x32xi32>
    %37 = arith.addi %36, %28 : vector<1x32xi32>
    %38 = vector.broadcast %26 : i32 to vector<16x1xi32>
    %39 = arith.cmpi slt, %32, %38 : vector<16x1xi32>
    %c0_i32_23 = arith.constant 0 : i32
    %40 = vector.broadcast %c0_i32_23 : i32 to vector<1x32xi32>
    %41 = arith.cmpi sge, %37, %40 : vector<1x32xi32>
    %42 = vector.broadcast %39 : vector<16x1xi1> to vector<16x32xi1>
    %43 = vector.broadcast %41 : vector<1x32xi1> to vector<16x32xi1>
    %44 = arith.andi %42, %43 : vector<16x32xi1>
    %45 = vector.broadcast %26 : i32 to vector<1x32xi32>
    %46 = arith.cmpi slt, %37, %45 : vector<1x32xi32>
    %47 = vector.broadcast %46 : vector<1x32xi1> to vector<16x32xi1>
    %48 = arith.andi %44, %47 : vector<16x32xi1>
    %cst = arith.constant 0.000000e+00 : f32
    %cst_24 = arith.constant -1.000000e+10 : f32
    %49 = vector.broadcast %cst : f32 to vector<16x32xf32>
    %50 = vector.broadcast %cst_24 : f32 to vector<16x32xf32>
    %51 = arith.select %48, %49, %50 : vector<16x32xi1>, vector<16x32xf32>
    %c2_i32_25 = arith.constant 2 : i32
    %52 = arith.muli %arg1, %c2_i32_25 : i32
    %c0_i32_26 = arith.constant 0 : i32
    %c0_i32_27 = arith.constant 0 : i32
    %c0_i32_28 = arith.constant 0 : i32
    %53 = tpu.memref_slice %arg4[%arg0, %52, %c0_i32_27, %c0_i32_28] : memref<2x2x8x128xbf16, #tpu.memory_space<any>> -> memref<1x2x8x128xbf16, #tpu.memory_space<any>>
    %54 = tpu.memref_squeeze %53 : memref<1x2x8x128xbf16, #tpu.memory_space<any>> -> memref<2x8x128xbf16, #tpu.memory_space<any>>
    %c1_i32_29 = arith.constant 1 : i32
    %c0_i32_30 = arith.constant 0 : i32
    %c0_i32_31 = arith.constant 0 : i32
    %55 = tpu.memref_slice %arg8[%c1_i32_29, %c0_i32_30, %c0_i32_31] : memref<4x8x128xbf16, #tpu.memory_space<vmem>> -> memref<2x8x128xbf16, #tpu.memory_space<vmem>>
    %56 = tpu.memref_slice %arg10[%c0_i32_26] : memref<6x!tpu.dma_semaphore, #tpu.memory_space<semaphore_mem>> -> memref<1x!tpu.dma_semaphore, #tpu.memory_space<semaphore_mem>>
    %57 = tpu.memref_squeeze %56 : memref<1x!tpu.dma_semaphore, #tpu.memory_space<semaphore_mem>> -> memref<!tpu.dma_semaphore, #tpu.memory_space<semaphore_mem>>
    tpu.wait_dma2 semaphore(%57 : memref<!tpu.dma_semaphore, #tpu.memory_space<semaphore_mem>>) src(%54 : memref<2x8x128xbf16, #tpu.memory_space<any>>) dst(%55 : memref<2x8x128xbf16, #tpu.memory_space<vmem>>)
    %c2_i32_32 = arith.constant 2 : i32
    %58 = arith.muli %arg1, %c2_i32_32 : i32
    %c1_i32_33 = arith.constant 1 : i32
    %c0_i32_34 = arith.constant 0 : i32
    %c0_i32_35 = arith.constant 0 : i32
    %59 = tpu.memref_slice %arg5[%arg0, %58, %c0_i32_34, %c0_i32_35] : memref<2x2x8x128xbf16, #tpu.memory_space<any>> -> memref<1x2x8x128xbf16, #tpu.memory_space<any>>
    %60 = tpu.memref_squeeze %59 : memref<1x2x8x128xbf16, #tpu.memory_space<any>> -> memref<2x8x128xbf16, #tpu.memory_space<any>>
    %c1_i32_36 = arith.constant 1 : i32
    %c0_i32_37 = arith.constant 0 : i32
    %c0_i32_38 = arith.constant 0 : i32
    %61 = tpu.memref_slice %arg9[%c1_i32_36, %c0_i32_37, %c0_i32_38] : memref<4x8x128xbf16, #tpu.memory_space<vmem>> -> memref<2x8x128xbf16, #tpu.memory_space<vmem>>
    %62 = tpu.memref_slice %arg10[%c1_i32_33] : memref<6x!tpu.dma_semaphore, #tpu.memory_space<semaphore_mem>> -> memref<1x!tpu.dma_semaphore, #tpu.memory_space<semaphore_mem>>
    %63 = tpu.memref_squeeze %62 : memref<1x!tpu.dma_semaphore, #tpu.memory_space<semaphore_mem>> -> memref<!tpu.dma_semaphore, #tpu.memory_space<semaphore_mem>>
    tpu.wait_dma2 semaphore(%63 : memref<!tpu.dma_semaphore, #tpu.memory_space<semaphore_mem>>) src(%60 : memref<2x8x128xbf16, #tpu.memory_space<any>>) dst(%61 : memref<2x8x128xbf16, #tpu.memory_space<vmem>>)
    %c0_i32_39 = arith.constant 0 : i32
    %64 = arith.cmpi sgt, %arg1, %c0_i32_39 : i32
    %65 = arith.extui %64 : i1 to i32
    %c0_i32_40 = arith.constant 0 : i32
    %66 = arith.cmpi ne, %65, %c0_i32_40 : i32
    scf.if %66 {
      %c2_i32_69 = arith.constant 2 : i32
      %123 = arith.muli %arg1, %c2_i32_69 : i32
      %c1_i32_70 = arith.constant 1 : i32
      %124 = arith.subi %123, %c1_i32_70 : i32
      %c2_i32_71 = arith.constant 2 : i32
      %c0_i32_72 = arith.constant 0 : i32
      %c0_i32_73 = arith.constant 0 : i32
      %125 = tpu.memref_slice %arg4[%arg0, %124, %c0_i32_72, %c0_i32_73] : memref<2x2x8x128xbf16, #tpu.memory_space<any>> -> memref<1x1x8x128xbf16, #tpu.memory_space<any>>
      %126 = tpu.memref_squeeze %125 : memref<1x1x8x128xbf16, #tpu.memory_space<any>> -> memref<1x8x128xbf16, #tpu.memory_space<any>>
      %c0_i32_74 = arith.constant 0 : i32
      %c0_i32_75 = arith.constant 0 : i32
      %c0_i32_76 = arith.constant 0 : i32
      %127 = tpu.memref_slice %arg8[%c0_i32_74, %c0_i32_75, %c0_i32_76] : memref<4x8x128xbf16, #tpu.memory_space<vmem>> -> memref<1x8x128xbf16, #tpu.memory_space<vmem>>
      %128 = tpu.memref_slice %arg10[%c2_i32_71] : memref<6x!tpu.dma_semaphore, #tpu.memory_space<semaphore_mem>> -> memref<1x!tpu.dma_semaphore, #tpu.memory_space<semaphore_mem>>
      %129 = tpu.memref_squeeze %128 : memref<1x!tpu.dma_semaphore, #tpu.memory_space<semaphore_mem>> -> memref<!tpu.dma_semaphore, #tpu.memory_space<semaphore_mem>>
      tpu.wait_dma2 semaphore(%129 : memref<!tpu.dma_semaphore, #tpu.memory_space<semaphore_mem>>) src(%126 : memref<1x8x128xbf16, #tpu.memory_space<any>>) dst(%127 : memref<1x8x128xbf16, #tpu.memory_space<vmem>>)
      %c2_i32_77 = arith.constant 2 : i32
      %130 = arith.muli %arg1, %c2_i32_77 : i32
      %c1_i32_78 = arith.constant 1 : i32
      %131 = arith.subi %130, %c1_i32_78 : i32
      %c3_i32 = arith.constant 3 : i32
      %c0_i32_79 = arith.constant 0 : i32
      %c0_i32_80 = arith.constant 0 : i32
      %132 = tpu.memref_slice %arg5[%arg0, %131, %c0_i32_79, %c0_i32_80] : memref<2x2x8x128xbf16, #tpu.memory_space<any>> -> memref<1x1x8x128xbf16, #tpu.memory_space<any>>
      %133 = tpu.memref_squeeze %132 : memref<1x1x8x128xbf16, #tpu.memory_space<any>> -> memref<1x8x128xbf16, #tpu.memory_space<any>>
      %c0_i32_81 = arith.constant 0 : i32
      %c0_i32_82 = arith.constant 0 : i32
      %c0_i32_83 = arith.constant 0 : i32
      %134 = tpu.memref_slice %arg9[%c0_i32_81, %c0_i32_82, %c0_i32_83] : memref<4x8x128xbf16, #tpu.memory_space<vmem>> -> memref<1x8x128xbf16, #tpu.memory_space<vmem>>
      %135 = tpu.memref_slice %arg10[%c3_i32] : memref<6x!tpu.dma_semaphore, #tpu.memory_space<semaphore_mem>> -> memref<1x!tpu.dma_semaphore, #tpu.memory_space<semaphore_mem>>
      %136 = tpu.memref_squeeze %135 : memref<1x!tpu.dma_semaphore, #tpu.memory_space<semaphore_mem>> -> memref<!tpu.dma_semaphore, #tpu.memory_space<semaphore_mem>>
      tpu.wait_dma2 semaphore(%136 : memref<!tpu.dma_semaphore, #tpu.memory_space<semaphore_mem>>) src(%133 : memref<1x8x128xbf16, #tpu.memory_space<any>>) dst(%134 : memref<1x8x128xbf16, #tpu.memory_space<vmem>>)
    } else {
    }
    %c0_i32_41 = arith.constant 0 : i32
    %67 = arith.cmpi slt, %arg1, %c0_i32_41 : i32
    %68 = arith.extui %67 : i1 to i32
    %c0_i32_42 = arith.constant 0 : i32
    %69 = arith.cmpi ne, %68, %c0_i32_42 : i32
    scf.if %69 {
      %c2_i32_69 = arith.constant 2 : i32
      %123 = arith.muli %arg1, %c2_i32_69 : i32
      %c2_i32_70 = arith.constant 2 : i32
      %124 = arith.addi %123, %c2_i32_70 : i32
      %c4_i32 = arith.constant 4 : i32
      %c0_i32_71 = arith.constant 0 : i32
      %c0_i32_72 = arith.constant 0 : i32
      %125 = tpu.memref_slice %arg4[%arg0, %124, %c0_i32_71, %c0_i32_72] : memref<2x2x8x128xbf16, #tpu.memory_space<any>> -> memref<1x1x8x128xbf16, #tpu.memory_space<any>>
      %126 = tpu.memref_squeeze %125 : memref<1x1x8x128xbf16, #tpu.memory_space<any>> -> memref<1x8x128xbf16, #tpu.memory_space<any>>
      %c3_i32 = arith.constant 3 : i32
      %c0_i32_73 = arith.constant 0 : i32
      %c0_i32_74 = arith.constant 0 : i32
      %127 = tpu.memref_slice %arg8[%c3_i32, %c0_i32_73, %c0_i32_74] : memref<4x8x128xbf16, #tpu.memory_space<vmem>> -> memref<1x8x128xbf16, #tpu.memory_space<vmem>>
      %128 = tpu.memref_slice %arg10[%c4_i32] : memref<6x!tpu.dma_semaphore, #tpu.memory_space<semaphore_mem>> -> memref<1x!tpu.dma_semaphore, #tpu.memory_space<semaphore_mem>>
      %129 = tpu.memref_squeeze %128 : memref<1x!tpu.dma_semaphore, #tpu.memory_space<semaphore_mem>> -> memref<!tpu.dma_semaphore, #tpu.memory_space<semaphore_mem>>
      tpu.wait_dma2 semaphore(%129 : memref<!tpu.dma_semaphore, #tpu.memory_space<semaphore_mem>>) src(%126 : memref<1x8x128xbf16, #tpu.memory_space<any>>) dst(%127 : memref<1x8x128xbf16, #tpu.memory_space<vmem>>)
      %c2_i32_75 = arith.constant 2 : i32
      %130 = arith.muli %arg1, %c2_i32_75 : i32
      %c2_i32_76 = arith.constant 2 : i32
      %131 = arith.addi %130, %c2_i32_76 : i32
      %c5_i32 = arith.constant 5 : i32
      %c0_i32_77 = arith.constant 0 : i32
      %c0_i32_78 = arith.constant 0 : i32
      %132 = tpu.memref_slice %arg5[%arg0, %131, %c0_i32_77, %c0_i32_78] : memref<2x2x8x128xbf16, #tpu.memory_space<any>> -> memref<1x1x8x128xbf16, #tpu.memory_space<any>>
      %133 = tpu.memref_squeeze %132 : memref<1x1x8x128xbf16, #tpu.memory_space<any>> -> memref<1x8x128xbf16, #tpu.memory_space<any>>
      %c3_i32_79 = arith.constant 3 : i32
      %c0_i32_80 = arith.constant 0 : i32
      %c0_i32_81 = arith.constant 0 : i32
      %134 = tpu.memref_slice %arg9[%c3_i32_79, %c0_i32_80, %c0_i32_81] : memref<4x8x128xbf16, #tpu.memory_space<vmem>> -> memref<1x8x128xbf16, #tpu.memory_space<vmem>>
      %135 = tpu.memref_slice %arg10[%c5_i32] : memref<6x!tpu.dma_semaphore, #tpu.memory_space<semaphore_mem>> -> memref<1x!tpu.dma_semaphore, #tpu.memory_space<semaphore_mem>>
      %136 = tpu.memref_squeeze %135 : memref<1x!tpu.dma_semaphore, #tpu.memory_space<semaphore_mem>> -> memref<!tpu.dma_semaphore, #tpu.memory_space<semaphore_mem>>
      tpu.wait_dma2 semaphore(%136 : memref<!tpu.dma_semaphore, #tpu.memory_space<semaphore_mem>>) src(%133 : memref<1x8x128xbf16, #tpu.memory_space<any>>) dst(%134 : memref<1x8x128xbf16, #tpu.memory_space<vmem>>)
    } else {
    }
    %c0 = arith.constant 0 : index
    %c0_43 = arith.constant 0 : index
    %c0_44 = arith.constant 0 : index
    %c0_45 = arith.constant 0 : index
    %70 = vector.load %arg3[%c0, %c0_43, %c0_44, %c0_45] : memref<1x2x8x128xbf16, #tpu.memory_space<vmem>>, vector<1x2x8x128xbf16>
    %71 = vector.shape_cast %70 : vector<1x2x8x128xbf16> to vector<2x8x128xbf16>
    %72 = vector.shape_cast %71 : vector<2x8x128xbf16> to vector<16x128xbf16>
    %c0_46 = arith.constant 0 : index
    %c0_47 = arith.constant 0 : index
    %c0_48 = arith.constant 0 : index
    %73 = vector.load %arg8[%c0_46, %c0_47, %c0_48] : memref<4x8x128xbf16, #tpu.memory_space<vmem>>, vector<4x8x128xbf16>
    %74 = vector.shape_cast %73 : vector<4x8x128xbf16> to vector<32x128xbf16>
    %c0_49 = arith.constant 0 : index
    %c0_50 = arith.constant 0 : index
    %c0_51 = arith.constant 0 : index
    %75 = vector.load %arg9[%c0_49, %c0_50, %c0_51] : memref<4x8x128xbf16, #tpu.memory_space<vmem>>, vector<4x8x128xbf16>
    %76 = vector.shape_cast %75 : vector<4x8x128xbf16> to vector<32x128xbf16>
    %77 = vector.extract_strided_slice %72 {offsets = [0, 0], sizes = [16, 64], strides = [1, 1]} : vector<16x128xbf16> to vector<16x64xbf16>
    %78 = vector.extract_strided_slice %74 {offsets = [0, 0], sizes = [32, 64], strides = [1, 1]} : vector<32x128xbf16> to vector<32x64xbf16>
    %cst_52 = arith.constant dense<0.000000e+00> : vector<16x32xf32>
    %79 = tpu.matmul %77, %78, %cst_52 {dimension_numbers = #tpu.dot_dimension_numbers<[1], [1], [0], [0], [0, 0, 1, 0], [], []>} : vector<16x64xbf16>, vector<32x64xbf16>, vector<16x32xf32> -> vector<16x32xf32>
    %c0_53 = arith.constant 0 : index
    %c0_54 = arith.constant 0 : index
    %c0_55 = arith.constant 0 : index
    %80 = vector.load %arg6[%c0_53, %c0_54, %c0_55] : memref<2x16x32xf32, #tpu.memory_space<vmem>>, vector<1x16x32xf32>
    %81 = vector.shape_cast %80 : vector<1x16x32xf32> to vector<16x32xf32>
    %82 = arith.addf %79, %81 : vector<16x32xf32>
    %83 = arith.addf %82, %51 : vector<16x32xf32>
    %cst_56 = arith.constant dense<0xFF800000> : vector<16xf32>
    %84 = vector.multi_reduction <maximumf>, %83, %cst_56 [1] : vector<16x32xf32> to vector<16xf32>
    %85 = vector.shape_cast %84 : vector<16xf32> to vector<16x1xf32>
    %86 = vector.broadcast %85 : vector<16x1xf32> to vector<16x32xf32>
    %87 = arith.subf %83, %86 : vector<16x32xf32>
    %88 = math.exp %87 : vector<16x32xf32>
    %cst_57 = arith.constant dense<0.000000e+00> : vector<16xf32>
    %89 = vector.multi_reduction <add>, %88, %cst_57 [1] : vector<16x32xf32> to vector<16xf32>
    %90 = vector.shape_cast %89 : vector<16xf32> to vector<16x1xf32>
    %91 = tpu.reciprocal %90 {approx = true} : vector<16x1xf32> -> vector<16x1xf32>
    %92 = arith.truncf %88 : vector<16x32xf32> to vector<16x32xbf16>
    %93 = vector.extract_strided_slice %76 {offsets = [0, 0], sizes = [32, 64], strides = [1, 1]} : vector<32x128xbf16> to vector<32x64xbf16>
    %cst_58 = arith.constant dense<0.000000e+00> : vector<16x64xf32>
    %94 = tpu.matmul %92, %93, %cst_58 {dimension_numbers = #tpu.dot_dimension_numbers<[1], [0], [0], [1], [0, 0, 1, 1], [], []>} : vector<16x32xbf16>, vector<32x64xbf16>, vector<16x64xf32> -> vector<16x64xf32>
    %95 = vector.broadcast %91 : vector<16x1xf32> to vector<16x64xf32>
    %96 = arith.mulf %94, %95 : vector<16x64xf32>
    %97 = vector.extract_strided_slice %72 {offsets = [0, 64], sizes = [16, 64], strides = [1, 1]} : vector<16x128xbf16> to vector<16x64xbf16>
    %98 = vector.extract_strided_slice %74 {offsets = [0, 64], sizes = [32, 64], strides = [1, 1]} : vector<32x128xbf16> to vector<32x64xbf16>
    %cst_59 = arith.constant dense<0.000000e+00> : vector<16x32xf32>
    %99 = tpu.matmul %97, %98, %cst_59 {dimension_numbers = #tpu.dot_dimension_numbers<[1], [1], [0], [0], [0, 0, 1, 0], [], []>} : vector<16x64xbf16>, vector<32x64xbf16>, vector<16x32xf32> -> vector<16x32xf32>
    %c1 = arith.constant 1 : index
    %c0_60 = arith.constant 0 : index
    %c0_61 = arith.constant 0 : index
    %100 = vector.load %arg6[%c1, %c0_60, %c0_61] : memref<2x16x32xf32, #tpu.memory_space<vmem>>, vector<1x16x32xf32>
    %101 = vector.shape_cast %100 : vector<1x16x32xf32> to vector<16x32xf32>
    %102 = arith.addf %99, %101 : vector<16x32xf32>
    %103 = arith.addf %102, %51 : vector<16x32xf32>
    %cst_62 = arith.constant dense<0xFF800000> : vector<16xf32>
    %104 = vector.multi_reduction <maximumf>, %103, %cst_62 [1] : vector<16x32xf32> to vector<16xf32>
    %105 = vector.shape_cast %104 : vector<16xf32> to vector<16x1xf32>
    %106 = vector.broadcast %105 : vector<16x1xf32> to vector<16x32xf32>
    %107 = arith.subf %103, %106 : vector<16x32xf32>
    %108 = math.exp %107 : vector<16x32xf32>
    %cst_63 = arith.constant dense<0.000000e+00> : vector<16xf32>
    %109 = vector.multi_reduction <add>, %108, %cst_63 [1] : vector<16x32xf32> to vector<16xf32>
    %110 = vector.shape_cast %109 : vector<16xf32> to vector<16x1xf32>
    %111 = tpu.reciprocal %110 {approx = true} : vector<16x1xf32> -> vector<16x1xf32>
    %112 = arith.truncf %108 : vector<16x32xf32> to vector<16x32xbf16>
    %113 = vector.extract_strided_slice %76 {offsets = [0, 64], sizes = [32, 64], strides = [1, 1]} : vector<32x128xbf16> to vector<32x64xbf16>
    %cst_64 = arith.constant dense<0.000000e+00> : vector<16x64xf32>
    %114 = tpu.matmul %112, %113, %cst_64 {dimension_numbers = #tpu.dot_dimension_numbers<[1], [0], [0], [1], [0, 0, 1, 1], [], []>} : vector<16x32xbf16>, vector<32x64xbf16>, vector<16x64xf32> -> vector<16x64xf32>
    %115 = vector.broadcast %111 : vector<16x1xf32> to vector<16x64xf32>
    %116 = arith.mulf %114, %115 : vector<16x64xf32>
    %117 = tpu.concatenate %96, %116 in 1 : vector<16x64xf32>, vector<16x64xf32> -> vector<16x128xf32>
    %118 = vector.shape_cast %117 : vector<16x128xf32> to vector<2x8x128xf32>
    %119 = arith.truncf %118 : vector<2x8x128xf32> to vector<2x8x128xbf16>
    %c0_65 = arith.constant 0 : index
    %c0_66 = arith.constant 0 : index
    %c0_67 = arith.constant 0 : index
    %c0_68 = arith.constant 0 : index
    %120 = vector.load %arg7[%c0_65, %c0_66, %c0_67, %c0_68] : memref<1x2x8x128xbf16, #tpu.memory_space<vmem>>, vector<1x2x8x128xbf16>
    %121 = vector.shape_cast %120 : vector<1x2x8x128xbf16> to vector<2x8x128xbf16>
    %122 = vector.shape_cast %119 : vector<2x8x128xbf16> to vector<1x2x8x128xbf16>
    tpu.vector_store %arg7[%c0_65, %c0_66, %c0_67, %c0_68], %122 {strides = array<i32>} : memref<1x2x8x128xbf16, #tpu.memory_space<vmem>>, vector<1x2x8x128xbf16>,
    return
  }
  func.func @transform_0(%arg0: i32, %arg1: i32, %arg2: memref<2xi32, #tpu.memory_space<smem>>) -> (i32, i32, i32, i32) {
    %c0_i32 = arith.constant 0 : i32
    %c0_i32_0 = arith.constant 0 : i32
    %c0_i32_1 = arith.constant 0 : i32
    return %arg0, %arg1, %c0_i32, %c0_i32_0 : i32, i32, i32, i32
  }
  func.func @transform_3(%arg0: i32, %arg1: i32, %arg2: memref<2xi32, #tpu.memory_space<smem>>) -> (i32, i32, i32) {
    %c0_i32 = arith.constant 0 : i32
    %c0_i32_0 = arith.constant 0 : i32
    %c0_i32_1 = arith.constant 0 : i32
    %c0_i32_2 = arith.constant 0 : i32
    return %c0_i32, %c0_i32_0, %c0_i32_1 : i32, i32, i32
  }
  func.func @transform_4(%arg0: i32, %arg1: i32, %arg2: memref<2xi32, #tpu.memory_space<smem>>) -> (i32, i32, i32, i32) {
    %c0_i32 = arith.constant 0 : i32
    %c0_i32_0 = arith.constant 0 : i32
    %c0_i32_1 = arith.constant 0 : i32
    return %arg0, %arg1, %c0_i32, %c0_i32_0 : i32, i32, i32, i32
  }
}

module attributes {stable_mosaic.version = 11 : i64} {
  func.func @_ff_kernel(%arg0: i32, %arg1: i32, %arg2: memref<32x32xf32, #tpu.memory_space<vmem>>, %arg3: memref<1x32xf32, #tpu.memory_space<vmem>>, %arg4: memref<32x64xbf16, #tpu.memory_space<vmem>>, %arg5: memref<64x32xbf16, #tpu.memory_space<vmem>>, %arg6: memref<32x32xf32, #tpu.memory_space<vmem>>, %arg7: memref<32x32xf32, #tpu.memory_space<vmem>>, %arg8: memref<32x32xbf16, #tpu.memory_space<vmem>>) attributes {dimension_semantics = [#tpu.dimension_semantics<parallel>, #tpu.dimension_semantics<arbitrary>], iteration_bounds = array<i64: 1, 1>, scalar_prefetch = 0 : i64, scratch_operands = 2 : i64, tpu.core_type = #tpu.core_type<tc>, window_params = [{transform_indices = @transform_0, window_bounds = array<i64: 32, 32>}, {pipeline_mode = #tpu.pipeline_mode<synchronous>, transform_indices = @transform_1, window_bounds = array<i64: 1, 32>}, {transform_indices = @transform_2, window_bounds = array<i64: 32, 64>}, {transform_indices = @transform_3, window_bounds = array<i64: 64, 32>}, {transform_indices = @transform_4, window_bounds = array<i64: 32, 32>}]} {
    %c0_i32 = arith.constant 0 : i32
    %0 = arith.cmpi eq, %arg1, %c0_i32 : i32
    %1 = arith.extui %0 : i1 to i32
    %c0_i32_0 = arith.constant 0 : i32
    %2 = arith.cmpi ne, %1, %c0_i32_0 : i32
    scf.if %2 {
      %c0_14 = arith.constant 0 : index
      %c0_15 = arith.constant 0 : index
      %17 = vector.load %arg2[%c0_14, %c0_15] : memref<32x32xf32, #tpu.memory_space<vmem>>, vector<32x32xf32>
      %18 = arith.mulf %17, %17 : vector<32x32xf32>
      %cst_16 = arith.constant dense<0.000000e+00> : vector<32xf32>
      %19 = vector.multi_reduction <add>, %18, %cst_16 [1] : vector<32x32xf32> to vector<32xf32>
      %20 = vector.shape_cast %19 : vector<32xf32> to vector<32x1xf32>
      %cst_17 = arith.constant 3.200000e+01 : f32
      %21 = vector.broadcast %cst_17 : f32 to vector<32x1xf32>
      %22 = arith.divf %20, %21 : vector<32x1xf32>
      %cst_18 = arith.constant 9.99999997E-7 : f32
      %23 = vector.broadcast %cst_18 : f32 to vector<32x1xf32>
      %24 = arith.addf %22, %23 : vector<32x1xf32>
      %25 = math.rsqrt %24 : vector<32x1xf32>
      %26 = vector.broadcast %25 : vector<32x1xf32> to vector<32x32xf32>
      %27 = arith.mulf %17, %26 : vector<32x32xf32>
      %c0_19 = arith.constant 0 : index
      %c0_20 = arith.constant 0 : index
      %28 = vector.load %arg3[%c0_19, %c0_20] : memref<1x32xf32, #tpu.memory_space<vmem>>, vector<1x32xf32>
      %29 = vector.broadcast %28 : vector<1x32xf32> to vector<32x32xf32>
      %30 = arith.mulf %27, %29 : vector<32x32xf32>
      %31 = arith.truncf %30 : vector<32x32xf32> to vector<32x32xbf16>
      %c0_21 = arith.constant 0 : index
      %c0_22 = arith.constant 0 : index
      %32 = vector.load %arg8[%c0_21, %c0_22] : memref<32x32xbf16, #tpu.memory_space<vmem>>, vector<32x32xbf16>
      tpu.vector_store %arg8[%c0_21, %c0_22], %31 {strides = array<i32>} : memref<32x32xbf16, #tpu.memory_space<vmem>>, vector<32x32xbf16>,
      %cst_23 = arith.constant 0.000000e+00 : f32
      %33 = vector.broadcast %cst_23 : f32 to vector<32x32xf32>
      %c0_24 = arith.constant 0 : index
      %c0_25 = arith.constant 0 : index
      %34 = vector.load %arg7[%c0_24, %c0_25] : memref<32x32xf32, #tpu.memory_space<vmem>>, vector<32x32xf32>
      tpu.vector_store %arg7[%c0_24, %c0_25], %33 {strides = array<i32>} : memref<32x32xf32, #tpu.memory_space<vmem>>, vector<32x32xf32>,
    } else {
    }
    %c0 = arith.constant 0 : index
    %c0_1 = arith.constant 0 : index
    %3 = vector.load %arg8[%c0, %c0_1] : memref<32x32xbf16, #tpu.memory_space<vmem>>, vector<32x32xbf16>
    %c0_2 = arith.constant 0 : index
    %c0_3 = arith.constant 0 : index
    %4 = vector.load %arg4[%c0_2, %c0_3] : memref<32x64xbf16, #tpu.memory_space<vmem>>, vector<32x64xbf16>
    %cst = arith.constant dense<0.000000e+00> : vector<32x64xf32>
    %5 = tpu.matmul %3, %4, %cst {dimension_numbers = #tpu.dot_dimension_numbers<[1], [0], [0], [1], [0, 0, 1, 1], [], []>} : vector<32x32xbf16>, vector<32x64xbf16>, vector<32x64xf32> -> vector<32x64xf32>
    %cst_4 = arith.constant 0.000000e+00 : f32
    %6 = vector.broadcast %cst_4 : f32 to vector<32x64xf32>
    %7 = arith.maximumf %5, %6 : vector<32x64xf32>
    %8 = arith.truncf %7 : vector<32x64xf32> to vector<32x64xbf16>
    %c0_5 = arith.constant 0 : index
    %c0_6 = arith.constant 0 : index
    %9 = vector.load %arg7[%c0_5, %c0_6] : memref<32x32xf32, #tpu.memory_space<vmem>>, vector<32x32xf32>
    %c0_7 = arith.constant 0 : index
    %c0_8 = arith.constant 0 : index
    %10 = vector.load %arg5[%c0_7, %c0_8] : memref<64x32xbf16, #tpu.memory_space<vmem>>, vector<64x32xbf16>
    %cst_9 = arith.constant dense<0.000000e+00> : vector<32x32xf32>
    %11 = tpu.matmul %8, %10, %cst_9 {dimension_numbers = #tpu.dot_dimension_numbers<[1], [0], [0], [1], [0, 0, 1, 1], [], []>} : vector<32x64xbf16>, vector<64x32xbf16>, vector<32x32xf32> -> vector<32x32xf32>
    %12 = arith.addf %9, %11 : vector<32x32xf32>
    %c0_10 = arith.constant 0 : index
    %c0_11 = arith.constant 0 : index
    %13 = vector.load %arg7[%c0_10, %c0_11] : memref<32x32xf32, #tpu.memory_space<vmem>>, vector<32x32xf32>
    tpu.vector_store %arg7[%c0_10, %c0_11], %12 {strides = array<i32>} : memref<32x32xf32, #tpu.memory_space<vmem>>, vector<32x32xf32>,
    %c0_i32_12 = arith.constant 0 : i32
    %14 = arith.cmpi eq, %arg1, %c0_i32_12 : i32
    %15 = arith.extui %14 : i1 to i32
    %c0_i32_13 = arith.constant 0 : i32
    %16 = arith.cmpi ne, %15, %c0_i32_13 : i32
    scf.if %16 {
      %c0_14 = arith.constant 0 : index
      %c0_15 = arith.constant 0 : index
      %17 = vector.load %arg2[%c0_14, %c0_15] : memref<32x32xf32, #tpu.memory_space<vmem>>, vector<32x32xf32>
      %c0_16 = arith.constant 0 : index
      %c0_17 = arith.constant 0 : index
      %18 = vector.load %arg7[%c0_16, %c0_17] : memref<32x32xf32, #tpu.memory_space<vmem>>, vector<32x32xf32>
      %19 = arith.addf %17, %18 : vector<32x32xf32>
      %c0_18 = arith.constant 0 : index
      %c0_19 = arith.constant 0 : index
      %20 = vector.load %arg6[%c0_18, %c0_19] : memref<32x32xf32, #tpu.memory_space<vmem>>, vector<32x32xf32>
      tpu.vector_store %arg6[%c0_18, %c0_19], %19 {strides = array<i32>} : memref<32x32xf32, #tpu.memory_space<vmem>>, vector<32x32xf32>,
    } else {
    }
    return
  }
  func.func @transform_0(%arg0: i32, %arg1: i32) -> (i32, i32) {
    %c0_i32 = arith.constant 0 : i32
    %c0_i32_0 = arith.constant 0 : i32
    return %arg0, %c0_i32 : i32, i32
  }
  func.func @transform_1(%arg0: i32, %arg1: i32) -> (i32, i32) {
    %c0_i32 = arith.constant 0 : i32
    %c0_i32_0 = arith.constant 0 : i32
    %c0_i32_1 = arith.constant 0 : i32
    return %c0_i32, %c0_i32_0 : i32, i32
  }
  func.func @transform_2(%arg0: i32, %arg1: i32) -> (i32, i32) {
    %c0_i32 = arith.constant 0 : i32
    %c0_i32_0 = arith.constant 0 : i32
    return %c0_i32, %arg1 : i32, i32
  }
  func.func @transform_3(%arg0: i32, %arg1: i32) -> (i32, i32) {
    %c0_i32 = arith.constant 0 : i32
    %c0_i32_0 = arith.constant 0 : i32
    return %arg1, %c0_i32 : i32, i32
  }
  func.func @transform_4(%arg0: i32, %arg1: i32) -> (i32, i32) {
    %c0_i32 = arith.constant 0 : i32
    %c0_i32_0 = arith.constant 0 : i32
    return %arg0, %c0_i32 : i32, i32
  }
}

module attributes {stable_mosaic.version = 11 : i64} {
  func.func @_rmsnorm_kernel(%arg0: i32, %arg1: memref<32x32xf32, #tpu.memory_space<vmem>>, %arg2: memref<1x32xf32, #tpu.memory_space<vmem>>, %arg3: memref<32x32xf32, #tpu.memory_space<vmem>>) attributes {dimension_semantics = [#tpu.dimension_semantics<parallel>], iteration_bounds = array<i64: 1>, scalar_prefetch = 0 : i64, scratch_operands = 0 : i64, tpu.core_type = #tpu.core_type<tc>, window_params = [{transform_indices = @transform_0, window_bounds = array<i64: 32, 32>}, {pipeline_mode = #tpu.pipeline_mode<synchronous>, transform_indices = @transform_1, window_bounds = array<i64: 1, 32>}, {transform_indices = @transform_2, window_bounds = array<i64: 32, 32>}]} {
    %c0 = arith.constant 0 : index
    %c0_0 = arith.constant 0 : index
    %0 = vector.load %arg1[%c0, %c0_0] : memref<32x32xf32, #tpu.memory_space<vmem>>, vector<32x32xf32>
    %1 = arith.mulf %0, %0 : vector<32x32xf32>
    %cst = arith.constant dense<0.000000e+00> : vector<32xf32>
    %2 = vector.multi_reduction <add>, %1, %cst [1] : vector<32x32xf32> to vector<32xf32>
    %3 = vector.shape_cast %2 : vector<32xf32> to vector<32x1xf32>
    %cst_1 = arith.constant 3.200000e+01 : f32
    %4 = vector.broadcast %cst_1 : f32 to vector<32x1xf32>
    %5 = arith.divf %3, %4 : vector<32x1xf32>
    %cst_2 = arith.constant 9.99999997E-7 : f32
    %6 = vector.broadcast %cst_2 : f32 to vector<32x1xf32>
    %7 = arith.addf %5, %6 : vector<32x1xf32>
    %8 = math.rsqrt %7 : vector<32x1xf32>
    %9 = vector.broadcast %8 : vector<32x1xf32> to vector<32x32xf32>
    %10 = arith.mulf %0, %9 : vector<32x32xf32>
    %c0_3 = arith.constant 0 : index
    %c0_4 = arith.constant 0 : index
    %11 = vector.load %arg2[%c0_3, %c0_4] : memref<1x32xf32, #tpu.memory_space<vmem>>, vector<1x32xf32>
    %12 = vector.broadcast %11 : vector<1x32xf32> to vector<32x32xf32>
    %13 = arith.mulf %10, %12 : vector<32x32xf32>
    %c0_5 = arith.constant 0 : index
    %c0_6 = arith.constant 0 : index
    %14 = vector.load %arg3[%c0_5, %c0_6] : memref<32x32xf32, #tpu.memory_space<vmem>>, vector<32x32xf32>
    tpu.vector_store %arg3[%c0_5, %c0_6], %13 {strides = array<i32>} : memref<32x32xf32, #tpu.memory_space<vmem>>, vector<32x32xf32>,
    return
  }
  func.func @transform_0(%arg0: i32) -> (i32, i32) {
    %c0_i32 = arith.constant 0 : i32
    %c0_i32_0 = arith.constant 0 : i32
    return %arg0, %c0_i32 : i32, i32
  }
  func.func @transform_1(%arg0: i32) -> (i32, i32) {
    %c0_i32 = arith.constant 0 : i32
    %c0_i32_0 = arith.constant 0 : i32
    %c0_i32_1 = arith.constant 0 : i32
    return %c0_i32, %c0_i32_0 : i32, i32
  }
  func.func @transform_2(%arg0: i32) -> (i32, i32) {
    %c0_i32 = arith.constant 0 : i32
    %c0_i32_0 = arith.constant 0 : i32
    return %arg0, %c0_i32 : i32, i32
  }
}

</mosaic_0001>

<bundles_post_ra>
// kernel: longt5_forward.11
= control target key start
LH: loop header
LB: loop body
LE: loop exit
PB: predicated region body
PF: predicated region fallthrough
CT: control target
= control target key end

     0   :  { %vm152_vm0 = vcmask 261120   ;;  %s285_s1 = inlined_call_operand.vmem [shape: bf16[128,32], index: 1, kind: input, shape index: {}]   ;;  %s286_s0 = inlined_call_operand.vmem [shape: bf16[32,128], index: 0, kind: input, shape index: {}]   ;;  %s287_s2 = inlined_call_operand.vmem [shape: f32[32,32], index: 2, kind: input, shape index: {}]   ;;  %s288_s3 = inlined_call_operand.vmem [shape: f32[32,32], index: 3, kind: output, shape index: {}]  }
   0x1   :  { %v201_v0 = vld [vmem:[%s285_s1 + $0x38] sm:$0xff]   ;;  %v202_v1 = vld [vmem:[%s285_s1 + $0x30] sm:$0xff]   ;;  %v203_v2 = vld [vmem:[%s285_s1 + $0x28] sm:$0xff]  }
   0x2   :  { %181 = vmatprep.subr.bf16.mxu0 %v201_v0  ;;  %v204_v3 = vld [vmem:[%s285_s1 + $0x20] sm:$0xff]   ;;  %v205_v5 = vld [vmem:[%s285_s1 + $0x18] sm:$0xff]   ;;  %v206_v6 = vld [vmem:[%s285_s1 + $0x10] sm:$0xff]  }
   0x3   :  { %182 = vmatpush3.bf16.msra.mxu0 %v201_v0  ;;  %v209_v4 = vld [vmem:[%s286_s0] sm:$0xff]   ;;  %v207_v7 = vld [vmem:[%s285_s1 + $0x8] sm:$0xff]   ;;  %v146_v10 = vld [vmem:[%s287_s2 + $0x10] sm:$0xff] }
   0x4   :  { %183 = vmatprep.subr.bf16.mxu0 %v202_v1  ;;  %197 = vmatprep.mubr.bf16.mxu0 %v209_v4  ;;  %v208_v8 = vld [vmem:[%s285_s1] sm:$0xff]   ;;  %v210_v9 = vld [vmem:[%s286_s0 + $0x8] sm:$0xff]   ;;  %v147_v15 = vld [vmem:[%s287_s2 + $0x18] sm:$0xff] }
   0x5   :  { %v144_v12 = vld [vmem:[%s287_s2] sm:$0xff]  ;;  %v145_v18 = vld [vmem:[%s287_s2 + $0x8] sm:$0xff] }
   0x7   :  { %184 = vmatpush3.bf16.msra.mxu0 %v202_v1 }
   0x8   :  { %185 = vmatprep.subr.bf16.mxu0 %v203_v2 }
   0xb   :  { %186 = vmatpush3.bf16.msra.mxu0 %v203_v2 }
   0xc   :  { %187 = vmatprep.subr.bf16.mxu0 %v204_v3 }
   0xf   :  { %188 = vmatpush3.bf16.msra.mxu0 %v204_v3 }
  0x10   :  { %189 = vmatprep.subr.bf16.mxu0 %v205_v5 }
  0x13   :  { %190 = vmatpush3.bf16.msra.mxu0 %v205_v5 }
  0x14   :  { %191 = vmatprep.subr.bf16.mxu0 %v206_v6 }
  0x17   :  { %192 = vmatpush3.bf16.msra.mxu0 %v206_v6 }
  0x18   :  { %193 = vmatprep.subr.bf16.mxu0 %v207_v7 }
  0x1b   :  { %194 = vmatpush3.bf16.msra.mxu0 %v207_v7 }
  0x1c   :  { %195 = vmatprep.subr.bf16.mxu0 %v208_v8 }
  0x1f   :  { %196 = vmatpush3.bf16.msra.mxu0 %v208_v8 }
  0x22   :  { %198 = vmatmul.mubr.bf16.vlgmr.msra.gmra.mxu0 %v210_v9 }
  0xe2   :  { %v199_v11 = vpop.f32.mrf.mxu0 }
  0xe3   :  { %v150_v13 = vadd.f32 %v199_v11, %v146_v10 }
  0xe4   :  { %v129_v14 = vpop.f32.mrf.mxu0 }
  0xe5   :  { %155 = vst.msk [vmem:[%s288_s3 + $0x10] sm:$0xff] %vm152_vm0, %v150_v13  ;;  %v148_v16 = vadd.f32 %v144_v12, %v129_v14 }
  0xe6   :  { %v200_v17 = vpop.f32.mrf.mxu0 }
  0xe7   :  { %153 = vst.msk [vmem:[%s288_s3] sm:$0xff] %vm152_vm0, %v148_v16  ;;  %v151_v19 = vadd.f32 %v200_v17, %v147_v15 }
  0xe8   :  { %v132_v20 = vpop.f32.mrf.mxu0 }
  0xe9   :  { %156 = vst.msk [vmem:[%s288_s3 + $0x18] sm:$0xff] %vm152_vm0, %v151_v19  ;;  %v149_v21 = vadd.f32 %v145_v18, %v132_v20 }
  0xeb   :  { %154 = vst.msk [vmem:[%s288_s3 + $0x8] sm:$0xff] %vm152_vm0, %v149_v21 }

// kernel: longt5_forward.9
= control target key start
LH: loop header
LB: loop body
LE: loop exit
PB: predicated region body
PF: predicated region fallthrough
CT: control target
= control target key end

     0   :  { %vm27_vm0 = vcmask 261120   ;;  %v372_v17 = vmov 0   ;;  %vm84_vm1 = vcmask 257024   ;;  %s458_s0 = inlined_call_operand.vmem [shape: f32[32,32], index: 0, kind: input, shape index: {}]   ;;  %s459_s2 = inlined_call_operand.vmem [shape: bf16[32,384], index: 2, kind: input, shape index: {}]   ;;  %s460_s1 = inlined_call_operand.vmem [shape: f32[1,32], index: 1, kind: input, shape index: {}]   ;;  %s461_s3 = inlined_call_operand.vmem [shape: bf16[32,384], index: 3, kind: output, shape index: {}]  }
   0x1   :  { %v19_v0 = vld [vmem:[%s458_s0] sm:$0xff]  ;;  %v21_v1 = vld [vmem:[%s458_s0 + $0x10] sm:$0xff]  ;;  %v20_v2 = vld [vmem:[%s458_s0 + $0x8] sm:$0xff]  ;;  %182 = vmatprep.mubr.bf16.mxu0 %v372_v17 }
   0x2   :  { %v23_v3 = vmul.f32 %v19_v0, %v19_v0  ;;  %v25_v4 = vmul.f32 %v21_v1, %v21_v1  ;;  %v24_v5 = vmul.f32 %v20_v2, %v20_v2  ;;  %v22_v6 = vld [vmem:[%s458_s0 + $0x18] sm:$0xff]  ;;  %v357_v14 = vld [vmem:[%s459_s2 + $0x20] ss:$12 sps:$4 sm:$0xff]   ;;  %v358_v15 = vld [vmem:[%s459_s2 + $0x4] ss:$12 sps:$4 sm:$0xff]  }
   0x3   :  { %v26_v7 = vmul.f32 %v22_v6, %v22_v6  ;;  %v354_v12 = vld [vmem:[%s459_s2 + $0x1c] ss:$12 sps:$4 sm:$0xff]   ;;  %v356_v13 = vld [vmem:[%s459_s2 + $0x18] ss:$12 sps:$4 sm:$0xff]   ;;  %v360_v16 = vld [vmem:[%s459_s2] ss:$12 sps:$4 sm:$0xff]   ;;  %345 = vmatprep.subr.bf16.mxu1 %v357_v14 }
   0x4   :  { %v28_v8 = vsel %vm27_vm0, %v23_v3, 0.0  ;;  %v34_v9 = vsel %vm27_vm0, %v25_v4, 0.0  ;;  %v31_v10 = vsel %vm27_vm0, %v24_v5, 0.0  ;;  %162 = vmatprep.subr.bf16.mxu0 %v354_v12  ;;  %v361_v18 = vld [vmem:[%s459_s2 + $0x8] ss:$12 sps:$4 sm:$0xff]   ;;  %346 = vmatpush3.bf16.msra.mxu1 %v357_v14 }
   0x5   :  { %29 = vadd.xlane.f32.xlu0 %v28_v8  ;;  %35 = vadd.xlane.f32.xlu1 %v34_v9  ;;  %v37_v11 = vsel %vm27_vm0, %v26_v7, 0.0  ;;  %v304_v32 = vld [vmem:[%s460_s1] ss:$0 sm:$0xff] }
   0x6   :  { %163 = vmatpush1.bf16.msra.mxu0 %v356_v13  ;;  %347 = vmatprep.subr.bf16.mxu1 %v361_v18 }
   0x7   :  { %164 = vmatprep.subr.bf16.mxu0 %v358_v15 }
   0x8   :  { %348 = vmatpush3.bf16.msra.mxu1 %v361_v18 }
   0x9   :  { %32 = vadd.xlane.f32.xlu0 %v31_v10  ;;  %38 = vadd.xlane.f32.xlu1 %v37_v11 }
   0xa   :  { %165 = vmatpush1.bf16.msra.mxu0 %v360_v16 }
  0x8e   :  { %v30_v19 = vpop.xlane.xlu0 %29  ;;  %v36_v20 = vpop.xlane.xlu1 %35 }
  0x8f   :  { %v41_v21 = vmul.f32 0.03125, %v30_v19  ;;  %v43_v22 = vmul.f32 0.03125, %v36_v20 }
  0x91   :  { %v45_v23 = vadd.f32 1e-06, %v41_v21  ;;  %v47_v24 = vadd.f32 1e-06, %v43_v22 }
  0x92   :  { %v33_v25 = vpop.xlane.xlu0 %32  ;;  %v39_v26 = vpop.xlane.xlu1 %38 }
  0x93   :  { %364 = vrsqrt.f32 %v45_v23  ;;  %v42_v27 = vmul.f32 0.03125, %v33_v25  ;;  %v44_v28 = vmul.f32 0.03125, %v39_v26 }
  0x94   :  { %366 = vrsqrt.f32 %v47_v24 }
  0x95   :  { %v46_v29 = vadd.f32 1e-06, %v42_v27  ;;  %v48_v30 = vadd.f32 1e-06, %v44_v28 }
  0x97   :  { %368 = vrsqrt.f32 %v46_v29 }
  0x98   :  { %370 = vrsqrt.f32 %v48_v30 }
  0xa0   :  { %v365_v31 = vpop.eup %364 }
  0xa1   :  { %v367_v33 = vpop.eup %366  ;;  %v53_v34 = vmul.f32 %v365_v31, %v19_v0 }
  0xa2   :  { %v55_v35 = vmul.f32 %v367_v33, %v21_v1 }
  0xa3   :  { %v64_v36 = vmul.f32 %v304_v32, %v53_v34 }
  0xa4   :  { %v369_v37 = vpop.eup %368  ;;  %v66_v38 = vmul.f32 %v304_v32, %v55_v35 }
  0xa5   :  { %v371_v39 = vpop.eup %370  ;;  %v329_v40 = vpack.c.bf16 %v64_v36, %v64_v36  ;;  %v54_v41 = vmul.f32 %v369_v37, %v20_v2 }
  0xa6   :  { %v331_v42 = vpack.c.bf16 %v66_v38, %v66_v38  ;;  %v56_v43 = vmul.f32 %v371_v39, %v22_v6 }
  0xa7   :  { %85 = vst.msk [vmem:[#allocation2] sm:$0xf] %vm84_vm1, %v329_v40  ;;  %v65_v44 = vmul.f32 %v304_v32, %v54_v41 }
  0xa8   :  { %87 = vst.msk [vmem:[#allocation2 + $0x8] sm:$0xf] %vm84_vm1, %v331_v42  ;;  %v67_v45 = vmul.f32 %v304_v32, %v56_v43 }
  0xa9   :  { %v330_v46 = vpack.c.bf16 %v65_v44, %v65_v44 }
  0xaa   :  { %v332_v47 = vpack.c.bf16 %v67_v45, %v67_v45 }
  0xab   :  { %86 = vst.msk [vmem:[#allocation2 + $0x4] sm:$0xf] %vm84_vm1, %v330_v46 }
  0xac   :  { %88 = vst.msk [vmem:[#allocation2 + $0xc] sm:$0xf] %vm84_vm1, %v332_v47 }
  0xb2   :  { %v362_v48 = vld [vmem:[#allocation2] sm:$0xff]  }
  0xb3   :  { %v363_v49 = vld [vmem:[#allocation2 + $0x8] sm:$0xff]   ;;  %317 = vmatmul.mubr.msk.bf16.vlgmr.msra.gmra.mxu0 %vm27_vm0, %v362_v48  ;;  %349 = vmatprep.mubr.msk.bf16.mxu1 %vm27_vm0, %v362_v48 }
  0xb4   :  { %350 = vmatmul.mubr.msk.bf16.vlgmr.msra.gmra.mxu1 %vm27_vm0, %v363_v49  ;;  %192 = vmatprep.mubr.bf16.mxu0 %v372_v17 }
  0xbb   :  { %318 = vmatmul.mubr.msk.bf16.gmra.mxu0 %vm27_vm0, %v363_v49 }
 0x173   :  { %v184_v50 = vpop.f32.mrf.mxu0 }
 0x174   :  { %v351_v51 = vpop.f32.mrf.mxu1 }
 0x175   :  { %v338_v52 = vpack.c.bf16 %v351_v51, %v351_v51  ;;  %v186_v53 = vpop.f32.mrf.mxu0 }
 0x176   :  { %v333_v54 = vpack.c.bf16 %v186_v53, %v184_v50  ;;  %v237_v55 = vpop.f32.mrf.mxu1 }
 0x177   :  { %297 = vst [vmem:[%s461_s3 + $0x20] sm:$0xf] %v338_v52  ;;  %v334_v56 = vpack.c.bf16 %v237_v55, %v237_v55  ;;  %v188_v57 = vpop.f32.mrf.mxu0 }
 0x178   :  { %292 = vst [vmem:[%s461_s3] sm:$0xff] %v333_v54  ;;  %v352_v58 = vpop.f32.mrf.mxu1 }
 0x179   :  { %293 = vst [vmem:[%s461_s3 + $0x8] sm:$0xf] %v334_v56  ;;  %v340_v59 = vpack.c.bf16 %v352_v58, %v352_v58  ;;  %v190_v60 = vpop.f32.mrf.mxu0 }
 0x17a   :  { %v335_v61 = vpack.c.bf16 %v190_v60, %v188_v57  ;;  %v240_v62 = vpop.f32.mrf.mxu1 }
 0x17b   :  { %299 = vst [vmem:[%s461_s3 + $0x2c] sm:$0xf] %v340_v59  ;;  %v336_v63 = vpack.c.bf16 %v240_v62, %v240_v62  ;;  %v194_v0 = vpop.f32.mrf.mxu0 }
 0x17c   :  { %294 = vst [vmem:[%s461_s3 + $0xc] sm:$0xff] %v335_v61 }
 0x17d   :  { %295 = vst [vmem:[%s461_s3 + $0x14] sm:$0xf] %v336_v63  ;;  %v196_v1 = vpop.f32.mrf.mxu0 }
 0x17e   :  { %v337_v2 = vpack.c.bf16 %v196_v1, %v194_v0 }
 0x17f   :  { %v198_v3 = vpop.f32.mrf.mxu0 }
 0x180   :  { %296 = vst [vmem:[%s461_s3 + $0x18] sm:$0xff] %v337_v2 }
 0x181   :  { %v200_v4 = vpop.f32.mrf.mxu0 }
 0x182   :  { %v339_v5 = vpack.c.bf16 %v200_v4, %v198_v3 }
 0x184   :  { %298 = vst [vmem:[%s461_s3 + $0x24] sm:$0xff] %v339_v5 }

// kernel: longt5_forward.10
= control target key start
LH: loop header
LB: loop body
LE: loop exit
PB: predicated region body
PF: predicated region fallthrough
CT: control target
= control target key end

     0   :  { %s1448_s0 = inlined_call_operand.vmem [shape: s32[2], index: 0, kind: input, shape index: {}]   ;;  %s1449_s1 = inlined_call_operand.vmem [shape: bf16[2,2,8,128], index: 1, kind: input, shape index: {}]   ;;  %s1450_s2 = inlined_call_operand.vmem [shape: bf16[2,2,8,128], index: 2, kind: input, shape index: {}]   ;;  %s1451_s3 = inlined_call_operand.vmem [shape: bf16[2,2,8,128], index: 3, kind: input, shape index: {}]   ;;  %s1452_s4 = inlined_call_operand.vmem [shape: f32[2,16,32], index: 4, kind: input, shape index: {}]   ;;  %s1453_s5 = inlined_call_operand.vmem [shape: bf16[2,2,8,128], index: 5, kind: output, shape index: {}]  }
   0x1   :  { %s10_s20 = sshll.u32 %s1448_s0, 4  ;;  %s11_s20 = int_to_ptr.vmem [resolvable:$true] %s10_s20 }
   0x2   :  { %s1256_s21 = scalar_lea.vmem %s11_s20, 16  ;;  %p1261_p1 = scmp.lt.s32.totalorder %s11_s20, %s11_s20 }
   0x3   :  { %p1257_p0 = scmp.ne.s32.totalorder %s11_s20, %s1256_s21  ;;  %p1262_p2 = scmp.lt.s32.totalorder %s1256_s21, %s1256_s21 }
   0x5   :  { %p1263_p3 = por %p1262_p2, %p1261_p1 }
   0x7   :  { %p1264_p4 = pnand %p1263_p3, %p1257_p0 }
   0x9   :  { %1267 = shalt.err (!%p1264_p4)  }
   0xa   :  { %s1298_s22 = smov [#allocation6]  }
   0xb   :  { %13 = dma.vmem_to_smem %s11_s20, 16, %s1298_s22, [#allocation5] }
   0xc   :  { %1280 = dma.done.wait [#allocation5], 16 }
   0xd   :  { %1281 = vsyncadd [#allocation5], 4294967280 }
   0xe   :  { %15 = sfence }
   0xf   :  { %s1337_s23 = smov 0   ;;  %s1339_s24 = smov 0  }
  0x10   :  { %s1341_s25 = smov 0  }
  0x11 LB: > { %s33_s0 = sadd.s32 1, %s1292_s24  ;;  %p1108_p5 = scmp.ge.s32.totalorder %s1296_s25, 1  ;;  %s1296_s25 = sphi %s1341_s25, %s21_s25   ;;  %s1292_s24 = sphi %s1339_s24, %s1455_s24   ;;  %s1288_s23 = sphi %s1337_s23, %s1454_s23  }
  0x12   : > { %p35_p6 = scmp.ge.s32.totalorder %s33_s0, 2  ;;  %p142_p7 = scmp.lt.s32.totalorder %s1296_s25, 3 }
  0x14   : > { %s1457_s0 = smov (%p35_p6, %s33_s0), 0  ;;  %p143_p8 = pnand %p1108_p5, %p142_p7 }
  0x15   : > { %p173_p9 = scmp.lt.s32.totalorder (!%p143_p8), %s1288_s23, 1  ;;  %s1147_s26 = sshll.u32 (!%p143_p8), %s1288_s23, 3 }
  0x16   : > { %146 = sbr.rel (%p143_p8) target bundleno = 1129 (0x469), region = 28  ;;  %s197_s29 = scalar_lea.vmem (!%p143_p8), %s1450_s2, %s1147_s26 }
  0x1b   : > { %s174_s30 = scalar_select %p173_p9, %s1288_s23, 1  ;;  %v232_v0 = vld [vmem:[%s197_s29] sm:$0xff] }
  0x1c   : > { %233 = vst [vmem:[#allocation2 + $0x4] sm:$0xff] %v232_v0 }
  0x1d   : > { %s1145_s6 = sshll.u32 %s174_s30, 3 }
  0x1e   : > { %s1361_s9 = scalar_lea.vmem %s1449_s1, %s1145_s6  ;;  %s1366_s12 = scalar_lea.vmem %s1453_s5, %s1145_s6 }
  0x1f   : > { %241 = vsyncadd [#allocation4], 128  ;;  %s243_s15 = scalar_lea.vmem %s1451_s3, %s1147_s26 }
  0x20   : > { %v279_v1 = vld [vmem:[%s243_s15] sm:$0xff] }
  0x21   : > { %280 = vst [vmem:[#allocation3 + $0x4] sm:$0xff] %v279_v1 }
  0x22   : > { %288 = vsyncadd [#allocation4 + $0x1], 128  ;;  %s512_s16 = sld [smem:[#allocation6 + %s1288_s23]]  ;;  %v515_v2 = vlaneseq  ;;  %v1299_v3 = vmov 0   ;;  %v1300_v9 = vmov -1e+10  }
  0x23   : > { %397 = vst [vmem:[#allocation2] sm:$0xf] %v1299_v3  ;;  %398 = vst [vmem:[#allocation3] sm:$0xf] %v1299_v3 }
  0x24   : > { %509 = vst [vmem:[#allocation2 + $0xc] sm:$0xf] %v1299_v3  ;;  %511 = vst [vmem:[#allocation3 + $0xc] sm:$0xf] %v1299_v3  ;;  %v519_v4 = vand.u32 127, %v515_v2  ;;  %v516_v5 = vshrl.u32 %v515_v2, 7 }
  0x26   : > { %v527_v6 = vadd.s32 4294967288, %v519_v4  ;;  %v517_v7 = vadd.s32 8, %v516_v5 }
  0x28   : > { %p513_p10 = scmp.lt.s32.totalorder %s512_s16, 16  ;;  %vm531_vm0 = vcmp.ge.s32.totalorder %v527_v6, 0 }
  0x2a   : > { %s1459_s16 = smov (!%p513_p10, %s512_s16), 16 }
  0x2b   : > { %v528_v8 = vstv %s1459_s16 }
  0x2c   : > { %vm529_vm1 = vcmp.lt.s32.totalorder %v516_v5, %v528_v8  ;;  %vm530_vm2 = vcmp.lt.s32.totalorder %v517_v7, %v528_v8  ;;  %vm540_vm3 = vcmp.lt.s32.totalorder %v527_v6, %v528_v8 }
  0x2d   : > { %vm538_vm4 = vmand %vm529_vm1, %vm531_vm0 }
  0x2e   : > { %vm539_vm5 = vmand %vm530_vm2, %vm531_vm0 }
  0x2f   : > { %vm543_vm6 = vmand %vm538_vm4, %vm540_vm3 }
  0x30   : > { %vm544_vm7 = vmand %vm539_vm5, %vm540_vm3  ;;  %v1371_v10 = vsel %vm543_vm6, 0.0, %v1300_v9 }
  0x31   : > { %v1373_v11 = vsel %vm544_vm7, 0.0, %v1300_v9 }
  0x32   : > { %1282 = dma.done.wait [#allocation4], 128 }
  0x33   : > { %1283 = vsyncadd [#allocation4], 4294967168 }
  0x34   : > { %1284 = dma.done.wait [#allocation4 + $0x1], 128 }
  0x35   : > { %1285 = vsyncadd [#allocation4 + $0x1], 4294967168  ;;  %v1301_v12 = vmov 0.0   ;;  %vm1302_vm8 = vmmov 0   ;;  %vm605_vm9 = vcmask 523264   ;;  %v1235_v13 = vld [vmem:[#allocation2 + $0x8] sm:$0xff]  }
  0x36   : > { %1168 = vmatprep.subr.bf16.mxu0 %v1301_v12  ;;  %1172 = vmatprep.mubr.msk.bf16.mxu0 %vm1302_vm8, %v1301_v12  ;;  %v613_v14 = vsel %vm605_vm9, %v1235_v13, 0  ;;  %v1236_v15 = vld [vmem:[#allocation2] sm:$0xff]   ;;  %s1303_s17 = smov 64   ;;  %v589_v22 = vld [vmem:[%s1452_s4 + $0x8] sm:$0xff]  ;;  %vm658_vm10 = vcmask 261120   ;;  %v1238_v30 = vld [vmem:[#allocation3 + $0x8] sm:$0xff]  }
  0x37   : > { %1176 = vmatprep.subr.bf16.mxu1 %v1301_v12  ;;  %1180 = vmatprep.mubr.msk.bf16.mxu1 %vm1302_vm8, %v1301_v12  ;;  %v610_v16 = vsel %vm605_vm9, %v1236_v15, 0  ;;  %v1237_v17 = vld [vmem:[%s1361_s9] sm:$0xff]   ;;  %v1239_v31 = vld [vmem:[#allocation3] sm:$0xff]   ;;  %v1134_v54 = vld [vmem:[%s1452_s4 + $0x18] sm:$0xff] }
  0x38   : > { %1169 = vmatpush3.bf16.xpose.msra.mxu0 %v613_v14  ;;  %745 = vrot.lane.b32.xlu1 %v1235_v13, %s1303_s17  ;;  %v588_v18 = vld [vmem:[%s1452_s4] sm:$0xff]  ;;  %v1133_v50 = vld [vmem:[%s1452_s4 + $0x10] sm:$0xff] }
  0x39   : > { %1170 = vmatprep.subr.bf16.mxu0 %v1301_v12  ;;  %1177 = vmatpush3.bf16.msra.mxu1 %v1238_v30 }
  0x3a   : > { %1178 = vmatprep.subr.bf16.mxu1 %v1301_v12 }
  0x3c   : > { %743 = vrot.lane.b32.xlu1 %v1236_v15, %s1303_s17 }
  0x3d   : > { %1179 = vmatpush3.bf16.msra.mxu1 %v1239_v31 }
  0x3e   : > { %1184 = vmatprep.subr.bf16.mxu1 %v1301_v12 }
  0x40   : > { %1171 = vmatpush3.bf16.xpose.msra.mxu0 %v610_v16 }
  0x41   : > { %1192 = vmatprep.subr.bf16.mxu0 %v1301_v12 }
  0x47   : > { %1173 = vmatmul.mubr.msk.bf16.vlgmr.msra.gmra.mxu0 %vm605_vm9, %v1237_v17 }
  0x48   : > { %1196 = vmatprep.mubr.msk.bf16.mxu0 %vm1302_vm8, %v1301_v12 }
  0xaa   : > { %v746_v38 = vpop.permute.xlu1 %745 }
  0xab   : > { %v754_v41 = vsel %vm605_vm9, %v746_v38, 0 }
  0xae   : > { %v744_v43 = vpop.permute.xlu1 %743 }
  0xaf   : > { %v751_v44 = vsel %vm605_vm9, %v744_v43, 0 }
 0x107   : > { %v649_v19 = vpop.f32.mrf.mxu0 }
 0x108   : > { %v650_v20 = vadd.f32 %v649_v19, %v588_v18 }
 0x109   : > { %v1174_v21 = vpop.f32.mrf.mxu0 }
 0x10a   : > { %v656_v23 = vadd.f32 %v650_v20, %v1371_v10 }
 0x10b   : > { %v652_v24 = vpop.f32.mrf.mxu0 }
 0x10c   : > { %v653_v25 = vadd.f32 %v652_v24, %v589_v22  ;;  %v659_v26 = vsel %vm658_vm10, %v656_v23, -inf }
 0x10d   : > { %660 = vmax.xlane.f32.xlu0 %v659_v26  ;;  %v1175_v27 = vpop.f32.mrf.mxu0 }
 0x10e   : > { %v657_v28 = vadd.f32 %v653_v25, %v1373_v11 }
 0x110   : > { %v662_v29 = vsel %vm658_vm10, %v657_v28, -inf }
 0x111   : > { %663 = vmax.xlane.f32.xlu0 %v662_v29 }
 0x127   : > { %741 = vrot.lane.b32.xlu0 %v1237_v17, %s1303_s17 }
 0x196   : > { %v661_v32 = vpop.xlane.xlu0 %660 }
 0x197   : > { %v665_v33 = vsub.f32 %v656_v23, %v661_v32 }
 0x199   : > { %v667_v34 = vmul.f32 1.442695, %v665_v33 }
 0x19a   : > { %v664_v35 = vpop.xlane.xlu0 %663 }
 0x19b   : > { %v666_v36 = vsub.f32 %v657_v28, %v664_v35  ;;  %1240 = vpow2.f32 %v667_v34 }
 0x19d   : > { %v669_v37 = vmul.f32 1.442695, %v666_v36 }
 0x19e   : > { %v742_v45 = vpop.permute.xlu0 %741 }
 0x19f   : > { %1242 = vpow2.f32 %v669_v37 }
 0x1a8   : > { %v1241_v39 = vpop.eup %1240 }
 0x1a9   : > { %v671_v9 = vsel %vm658_vm10, %v1241_v39, 0.0 }
 0x1ac   : > { %v1243_v40 = vpop.eup %1242 }
 0x1ad   : > { %v679_v42 = vpack.c.bf16 %v1243_v40, %v1241_v39 }
 0x1af   : > { %1181 = vmatmul.mubr.msk.bf16.vlgmr.msra.gmra.mxu1 %vm658_vm10, %v679_v42 }
 0x1b0   : > { %1185 = vmatpush3.bf16.xpose.msra.mxu1 %v754_v41  ;;  %1188 = vmatprep.mubr.msk.bf16.mxu1 %vm1302_vm8, %v1301_v12 }
 0x1b1   : > { %1186 = vmatprep.subr.bf16.mxu1 %v1301_v12 }
 0x1b8   : > { %1187 = vmatpush3.bf16.xpose.msra.mxu1 %v751_v44 }
 0x1bf   : > { %1189 = vmatmul.mubr.msk.bf16.vlgmr.msra.gmra.mxu1 %vm605_vm9, %v742_v45 }
 0x26f   : > { %v1411_v46 = vpop.f32.mrf.mxu1 }
 0x271   : > { %v1182_v47 = vpop.f32.mrf.mxu1 }
 0x273   : > { %v1413_v48 = vpop.f32.mrf.mxu1 }
 0x275   : > { %v1183_v49 = vpop.f32.mrf.mxu1 }
 0x27f   : > { %v790_v51 = vpop.f32.mrf.mxu1 }
 0x280   : > { %v791_v52 = vadd.f32 %v1133_v50, %v790_v51 }
 0x281   : > { %v1190_v53 = vpop.f32.mrf.mxu1 }
 0x282   : > { %v797_v55 = vadd.f32 %v791_v52, %v1371_v10 }
 0x283   : > { %v793_v56 = vpop.f32.mrf.mxu1 }
 0x284   : > { %v794_v57 = vadd.f32 %v1134_v54, %v793_v56  ;;  %v799_v58 = vsel %vm658_vm10, %v797_v55, -inf }
 0x285   : > { %800 = vmax.xlane.f32.xlu1 %v799_v58  ;;  %v1191_v59 = vpop.f32.mrf.mxu1 }
 0x286   : > { %v798_v60 = vadd.f32 %v794_v57, %v1373_v11 }
 0x288   : > { %v802_v61 = vsel %vm658_vm10, %v798_v60, -inf }
 0x289   : > { %803 = vmax.xlane.f32.xlu0 %v802_v61 }
 0x296   : > { %822 = vrot.lane.b32.xlu1 %v1238_v30, %s1303_s17 }
 0x29f   : > { %820 = vrot.lane.b32.xlu0 %v1239_v31, %s1303_s17 }
 0x30e   : > { %v801_v62 = vpop.xlane.xlu1 %800 }
 0x30f   : > { %v805_v63 = vsub.f32 %v797_v55, %v801_v62 }
 0x311   : > { %v807_v0 = vmul.f32 1.442695, %v805_v63 }
 0x312   : > { %v804_v1 = vpop.xlane.xlu0 %803  ;;  %v823_v2 = vpop.permute.xlu1 %822 }
 0x313   : > { %1244 = vpow2.f32 %v807_v0  ;;  %v806_v3 = vsub.f32 %v798_v60, %v804_v1  ;;  %1193 = vmatpush3.bf16.msra.mxu0 %v823_v2 }
 0x314   : > { %1194 = vmatprep.subr.bf16.mxu0 %v1301_v12  ;;  %v674_v12 = vsel %vm658_vm10, %v1243_v40, 0.0 }
 0x315   : > { %v809_v4 = vmul.f32 1.442695, %v806_v3 }
 0x316   : > { %v821_v5 = vpop.permute.xlu0 %820 }
 0x317   : > { %1246 = vpow2.f32 %v809_v4  ;;  %1195 = vmatpush3.bf16.msra.mxu0 %v821_v5 }
 0x320   : > { %v1245_v6 = vpop.eup %1244 }
 0x321   : > { %v811_v7 = vsel %vm658_vm10, %v1245_v6, 0.0 }
 0x322   : > { %812 = vadd.xlane.f32.xlu1 %v811_v7 }
 0x324   : > { %v1247_v8 = vpop.eup %1246 }
 0x325   : > { %v814_v10 = vsel %vm658_vm10, %v1247_v8, 0.0  ;;  %v819_v11 = vpack.c.bf16 %v1247_v8, %v1245_v6 }
 0x326   : > { %672 = vadd.xlane.f32.xlu1 %v671_v9  ;;  %815 = vadd.xlane.f32.xlu0 %v814_v10 }
 0x327   : > { %1197 = vmatmul.mubr.msk.bf16.vlgmr.msra.gmra.mxu0 %vm658_vm10, %v819_v11 }
 0x32a   : > { %675 = vadd.xlane.f32.xlu1 %v674_v12 }
 0x3ab   : > { %v813_v13 = vpop.xlane.xlu1 %812 }
 0x3ac   : > { %1248 = vrcp.f32 %v813_v13 }
 0x3af   : > { %v816_v14 = vpop.xlane.xlu0 %815  ;;  %v673_v24 = vpop.xlane.xlu1 %672 }
 0x3b0   : > { %1250 = vrcp.f32 %v816_v14 }
 0x3b1   : > { %1252 = vrcp.f32 %v673_v24 }
 0x3b3   : > { %v676_v25 = vpop.xlane.xlu1 %675 }
 0x3b4   : > { %1254 = vrcp.f32 %v676_v25 }
 0x3b9   : > { %v1249_v17 = vpop.eup %1248 }
 0x3bd   : > { %v1251_v18 = vpop.eup %1250 }
 0x3be   : > { %v1253_v26 = vpop.eup %1252 }
 0x3bf   : > { %v736_v29 = vmul.f32 %v1253_v26, %v1411_v46 }
 0x3c1   : > { %v1255_v27 = vpop.eup %1254 }
 0x3c2   : > { %v737_v30 = vmul.f32 %v1255_v27, %v1413_v48 }
 0x3e7   : > { %v863_v15 = vpop.f32.mrf.mxu0 }
 0x3e8   : > { %v870_v20 = vmul.f32 %v1249_v17, %v863_v15 }
 0x3e9   : > { %v1198_v16 = vpop.f32.mrf.mxu0 }
 0x3eb   : > { %v866_v19 = vpop.f32.mrf.mxu0 }
 0x3ec   : > { %v871_v21 = vmul.f32 %v1251_v18, %v866_v19 }
 0x3ed   : > { %v1199_v22 = vpop.f32.mrf.mxu0 }
 0x3ee   : > { %v1230_v23 = vpack.i.bf16 %v871_v21, %v870_v20 }
 0x3f0   : > { %1231 = vrot.lane.b32.xlu1 %v1230_v23, %s1303_s17 }
 0x462   : > { %v1232_v28 = vpop.permute.xlu1 %1231 }
 0x463   : > { %v1234_v31 = vunpack.i.h.bf16 %v1232_v28  ;;  %v1233_v32 = vunpack.i.l.bf16 %v1232_v28 }
 0x465   : > { %v881_v33 = vsel %vm605_vm9, %v737_v30, %v1234_v31  ;;  %v880_v34 = vsel %vm605_vm9, %v736_v29, %v1233_v32 }
 0x466   : > { %v1154_v35 = vpack.c.bf16 %v881_v33, %v880_v34 }
 0x468   : > { %1155 = vst [vmem:[%s1366_s12] sm:$0xff] %v1154_v35  }
 0x469 PF: > { %s21_s25 = sadd.s32 1, %s1296_s25   ;;  %s1454_s23 = smov %s1292_s24 }
 0x46a   : > { %p18_p11 = scmp.ge.s32.totalorder %s21_s25, 4   ;;  %s1455_s24 = smov %s1457_s0 }
 0x46c   :  { %20 = sbr.rel (!%p18_p11) target bundleno = 17 (0x11), region = 353 }
 0x471   :  { %916 = vsyncmov [#allocation4] }
 0x474   :  { %s917_s28 = vpop.sfrf %916 }
 0x475   :  { %p1139_p12 = scmp.ne.s32.totalorder %s917_s28, 0 }
 0x477   :  { %921 = shalt.err (%p1139_p12)  }
 0x478   :  { %923 = vsyncmov [#allocation4 + $0x1] }
 0x47b   :  { %s924_s29 = vpop.sfrf %923 }
 0x47c   :  { %p1140_p13 = scmp.ne.s32.totalorder %s924_s29, 0 }
 0x47e   :  { %928 = shalt.err (%p1140_p13)  }
 0x47f   :  { %930 = vsyncmov [#allocation4 + $0x2] }
 0x482   :  { %s931_s30 = vpop.sfrf %930 }
 0x483   :  { %p1141_p0 = scmp.ne.s32.totalorder %s931_s30, 0 }
 0x485   :  { %935 = shalt.err (%p1141_p0)  }
 0x486   :  { %937 = vsyncmov [#allocation4 + $0x3] }
 0x489   :  { %s938_s6 = vpop.sfrf %937 }
 0x48a   :  { %p1142_p1 = scmp.ne.s32.totalorder %s938_s6, 0 }
 0x48c   :  { %942 = shalt.err (%p1142_p1)  }
 0x48d   :  { %944 = vsyncmov [#allocation4 + $0x4] }
 0x490   :  { %s945_s0 = vpop.sfrf %944 }
 0x491   :  { %p1143_p2 = scmp.ne.s32.totalorder %s945_s0, 0 }
 0x493   :  { %949 = shalt.err (%p1143_p2)  }
 0x494   :  { %951 = vsyncmov [#allocation4 + $0x5] }
 0x497   :  { %s952_s1 = vpop.sfrf %951 }
 0x498   :  { %p1144_p3 = scmp.ne.s32.totalorder %s952_s1, 0 }
 0x49a   :  { %956 = shalt.err (%p1144_p3)  }

// kernel: longt5_forward.12
= control target key start
LH: loop header
LB: loop body
LE: loop exit
PB: predicated region body
PF: predicated region fallthrough
CT: control target
= control target key end

     0   :  { %vm30_vm0 = vcmask 261120   ;;  %vm87_vm1 = vcmask 257024   ;;  %v379_v49 = vmov 0.0   ;;  %vm224_vm2 = vcmask 523264   ;;  %s492_s0 = inlined_call_operand.vmem [shape: f32[32,32], index: 0, kind: input, shape index: {}]   ;;  %s493_s2 = inlined_call_operand.vmem [shape: bf16[32,64], index: 2, kind: input, shape index: {}]   ;;  %s494_s3 = inlined_call_operand.vmem [shape: bf16[64,32], index: 3, kind: input, shape index: {}]   ;;  %s495_s1 = inlined_call_operand.vmem [shape: f32[1,32], index: 1, kind: input, shape index: {}]   ;;  %s496_s4 = inlined_call_operand.vmem [shape: f32[32,32], index: 4, kind: output, shape index: {}]  }
   0x1   :  { %v408_v0 = vld [vmem:[%s492_s0 + $0x10] sm:$0xff]  ;;  %v413_v1 = vld [vmem:[%s492_s0] sm:$0xff]  ;;  %v418_v2 = vld [vmem:[%s492_s0 + $0x8] sm:$0xff]  ;;  %94 = vst.msk [vmem:[#allocation2 + $0x10] sm:$0xff] %vm30_vm0, %v379_v49 }
   0x2   :  { %v28_v3 = vmul.f32 %v408_v0, %v408_v0  ;;  %v425_v4 = vld [vmem:[%s492_s0 + $0x18] sm:$0xff]  ;;  %v26_v5 = vmul.f32 %v413_v1, %v413_v1  ;;  %v27_v6 = vmul.f32 %v418_v2, %v418_v2  ;;  %v363_v12 = vld [vmem:[%s493_s2 + $0x8] sm:$0xff]   ;;  %v364_v13 = vld [vmem:[%s493_s2] sm:$0xff]   ;;  %92 = vst.msk [vmem:[#allocation2] sm:$0xff] %vm30_vm0, %v379_v49 }
   0x3   :  { %v29_v7 = vmul.f32 %v425_v4, %v425_v4  ;;  %342 = vmatprep.subr.bf16.mxu0 %v363_v12  ;;  %v367_v14 = vld [vmem:[%s494_s3 + $0x18] sm:$0xff]   ;;  %v311_v28 = vld [vmem:[%s495_s1] ss:$0 sm:$0xff]  ;;  %v368_v46 = vld [vmem:[%s494_s3 + $0x10] sm:$0xff]   ;;  %93 = vst.msk [vmem:[#allocation2 + $0x8] sm:$0xff] %vm30_vm0, %v379_v49 }
   0x4   :  { %v37_v8 = vsel %vm30_vm0, %v28_v3, 0.0  ;;  %v31_v9 = vsel %vm30_vm0, %v26_v5, 0.0  ;;  %v34_v11 = vsel %vm30_vm0, %v27_v6, 0.0  ;;  %343 = vmatpush3.bf16.msra.mxu0 %v363_v12  ;;  %350 = vmatprep.subr.bf16.mxu1 %v367_v14  ;;  %v369_v47 = vld [vmem:[%s494_s3 + $0x8] sm:$0xff]   ;;  %v370_v48 = vld [vmem:[%s494_s3] sm:$0xff]   ;;  %95 = vst.msk [vmem:[#allocation2 + $0x18] sm:$0xff] %vm30_vm0, %v379_v49 }
   0x5   :  { %38 = vadd.xlane.f32.xlu1 %v37_v8  ;;  %32 = vadd.xlane.f32.xlu0 %v31_v9  ;;  %v40_v10 = vsel %vm30_vm0, %v29_v7, 0.0 }
   0x6   :  { %344 = vmatprep.subr.bf16.mxu0 %v364_v13  ;;  %351 = vmatpush3.bf16.msra.mxu1 %v367_v14 }
   0x7   :  { %352 = vmatprep.subr.bf16.mxu1 %v368_v46 }
   0x8   :  { %345 = vmatpush3.bf16.msra.mxu0 %v364_v13  ;;  %v190_v60 = vld [vmem:[#allocation2 + $0x10] sm:$0xff] }
   0x9   :  { %41 = vadd.xlane.f32.xlu1 %v40_v10  ;;  %35 = vadd.xlane.f32.xlu0 %v34_v11  ;;  %v188_v62 = vld [vmem:[#allocation2] sm:$0xff] }
   0xa   :  { %353 = vmatpush3.bf16.msra.mxu1 %v368_v46  ;;  %v189_v8 = vld [vmem:[#allocation2 + $0x8] sm:$0xff] }
   0xb   :  { %354 = vmatprep.subr.bf16.mxu1 %v369_v47  ;;  %v191_v5 = vld [vmem:[#allocation2 + $0x18] sm:$0xff] }
   0xe   :  { %355 = vmatpush3.bf16.msra.mxu1 %v369_v47 }
   0xf   :  { %356 = vmatprep.subr.bf16.mxu1 %v370_v48 }
  0x12   :  { %357 = vmatpush3.bf16.msra.mxu1 %v370_v48 }
  0x8e   :  { %v39_v15 = vpop.xlane.xlu1 %38  ;;  %v33_v16 = vpop.xlane.xlu0 %32 }
  0x8f   :  { %v46_v17 = vmul.f32 0.03125, %v39_v15  ;;  %v44_v18 = vmul.f32 0.03125, %v33_v16 }
  0x91   :  { %v50_v19 = vadd.f32 1e-06, %v46_v17  ;;  %v48_v20 = vadd.f32 1e-06, %v44_v18 }
  0x92   :  { %v42_v21 = vpop.xlane.xlu1 %41  ;;  %v36_v22 = vpop.xlane.xlu0 %35 }
  0x93   :  { %371 = vrsqrt.f32 %v50_v19  ;;  %v47_v23 = vmul.f32 0.03125, %v42_v21  ;;  %v45_v24 = vmul.f32 0.03125, %v36_v22 }
  0x94   :  { %373 = vrsqrt.f32 %v48_v20 }
  0x95   :  { %v51_v25 = vadd.f32 1e-06, %v47_v23  ;;  %v49_v26 = vadd.f32 1e-06, %v45_v24 }
  0x97   :  { %375 = vrsqrt.f32 %v51_v25 }
  0x98   :  { %377 = vrsqrt.f32 %v49_v26 }
  0xa0   :  { %v372_v27 = vpop.eup %371 }
  0xa1   :  { %v374_v29 = vpop.eup %373  ;;  %v58_v30 = vmul.f32 %v372_v27, %v408_v0 }
  0xa2   :  { %v56_v31 = vmul.f32 %v374_v29, %v413_v1 }
  0xa3   :  { %v69_v32 = vmul.f32 %v311_v28, %v58_v30 }
  0xa4   :  { %v376_v33 = vpop.eup %375  ;;  %v67_v34 = vmul.f32 %v311_v28, %v56_v31 }
  0xa5   :  { %v378_v35 = vpop.eup %377  ;;  %v330_v36 = vpack.c.bf16 %v69_v32, %v69_v32  ;;  %v59_v37 = vmul.f32 %v376_v33, %v425_v4 }
  0xa6   :  { %v328_v38 = vpack.c.bf16 %v67_v34, %v67_v34  ;;  %v57_v39 = vmul.f32 %v378_v35, %v418_v2 }
  0xa7   :  { %90 = vst.msk [vmem:[#allocation3 + $0x8] sm:$0xf] %vm87_vm1, %v330_v36  ;;  %v70_v40 = vmul.f32 %v311_v28, %v59_v37 }
  0xa8   :  { %88 = vst.msk [vmem:[#allocation3] sm:$0xf] %vm87_vm1, %v328_v38  ;;  %v68_v41 = vmul.f32 %v311_v28, %v57_v39 }
  0xa9   :  { %v331_v42 = vpack.c.bf16 %v70_v40, %v70_v40 }
  0xaa   :  { %v329_v43 = vpack.c.bf16 %v68_v41, %v68_v41 }
  0xab   :  { %91 = vst.msk [vmem:[#allocation3 + $0xc] sm:$0xf] %vm87_vm1, %v331_v42 }
  0xac   :  { %89 = vst.msk [vmem:[#allocation3 + $0x4] sm:$0xf] %vm87_vm1, %v329_v43 }
  0xb2   :  { %v366_v44 = vld [vmem:[#allocation3 + $0x8] sm:$0xff]  }
  0xb3   :  { %v365_v45 = vld [vmem:[#allocation3] sm:$0xff]  }
  0xb4   :  { %346 = vmatprep.mubr.msk.bf16.mxu0 %vm30_vm0, %v365_v45 }
  0xb5   :  { %347 = vmatmul.mubr.msk.bf16.vlgmr.msra.gmra.mxu0 %vm30_vm0, %v366_v44 }
 0x175   :  { %v348_v50 = vpop.f32.mrf.mxu0 }
 0x176   :  { %v184_v57 = vmax.f32 %v348_v50, 0.0 }
 0x177   :  { %v167_v51 = vpop.f32.mrf.mxu0 }
 0x178   :  { %v182_v55 = vmax.f32 %v167_v51, 0.0 }
 0x179   :  { %v349_v52 = vpop.f32.mrf.mxu0 }
 0x17a   :  { %v185_v53 = vmax.f32 %v349_v52, 0.0 }
 0x17b   :  { %v170_v54 = vpop.f32.mrf.mxu0 }
 0x17c   :  { %v183_v56 = vmax.f32 %v170_v54, 0.0  ;;  %v187_v59 = vpack.c.bf16 %v185_v53, %v184_v57 }
 0x17e   :  { %v186_v58 = vpack.c.bf16 %v183_v56, %v182_v55 }
 0x180   :  { %358 = vmatprep.mubr.msk.bf16.mxu1 %vm224_vm2, %v186_v58 }
 0x181   :  { %359 = vmatmul.mubr.msk.bf16.vlgmr.msra.gmra.mxu1 %vm224_vm2, %v187_v59 }
 0x241   :  { %v360_v61 = vpop.f32.mrf.mxu1 }
 0x242   :  { %v282_v63 = vadd.f32 %v360_v61, %v190_v60 }
 0x243   :  { %v265_v3 = vpop.f32.mrf.mxu1 }
 0x244   :  { %286 = vst.msk [vmem:[#allocation2 + $0x10] sm:$0xff] %vm30_vm0, %v282_v63  ;;  %v280_v6 = vadd.f32 %v265_v3, %v188_v62 }
 0x245   :  { %v361_v7 = vpop.f32.mrf.mxu1 }
 0x246   :  { %284 = vst.msk [vmem:[#allocation2] sm:$0xff] %vm30_vm0, %v280_v6  ;;  %v283_v9 = vadd.f32 %v361_v7, %v191_v5 }
 0x247   :  { %v268_v10 = vpop.f32.mrf.mxu1 }
 0x248   :  { %287 = vst.msk [vmem:[#allocation2 + $0x18] sm:$0xff] %vm30_vm0, %v283_v9  ;;  %v281_v11 = vadd.f32 %v268_v10, %v189_v8 }
 0x24a   :  { %285 = vst.msk [vmem:[#allocation2 + $0x8] sm:$0xff] %vm30_vm0, %v281_v11 }
 0x24b   :  { %v297_v12 = vld [vmem:[#allocation2 + $0x10] sm:$0xff] }
 0x24c   :  { %v301_v13 = vadd.f32 %v297_v12, %v408_v0 }
 0x24d   :  { %v295_v14 = vld [vmem:[#allocation2] sm:$0xff] }
 0x24e   :  { %305 = vst.msk [vmem:[%s496_s4 + $0x10] sm:$0xff] %vm30_vm0, %v301_v13  ;;  %v299_v15 = vadd.f32 %v295_v14, %v413_v1 }
 0x24f   :  { %v298_v16 = vld [vmem:[#allocation2 + $0x18] sm:$0xff] }
 0x250   :  { %303 = vst.msk [vmem:[%s496_s4] sm:$0xff] %vm30_vm0, %v299_v15  ;;  %v302_v17 = vadd.f32 %v298_v16, %v425_v4 }
 0x251   :  { %v296_v18 = vld [vmem:[#allocation2 + $0x8] sm:$0xff] }
 0x252   :  { %306 = vst.msk [vmem:[%s496_s4 + $0x18] sm:$0xff] %vm30_vm0, %v302_v17  ;;  %v300_v0 = vadd.f32 %v296_v18, %v418_v2 }
 0x254   :  { %304 = vst.msk [vmem:[%s496_s4 + $0x8] sm:$0xff] %vm30_vm0, %v300_v0 }

// kernel: longt5_forward.17
= control target key start
LH: loop header
LB: loop body
LE: loop exit
PB: predicated region body
PF: predicated region fallthrough
CT: control target
= control target key end

     0   :  { %vm20_vm0 = vcmask 261120   ;;  %s159_s0 = inlined_call_operand.vmem [shape: f32[32,32], index: 0, kind: input, shape index: {}]   ;;  %s160_s1 = inlined_call_operand.vmem [shape: f32[1,32], index: 1, kind: input, shape index: {}]   ;;  %s161_s2 = inlined_call_operand.hbm [shape: f32[32,32], index: 2, kind: output, shape index: {}]  }
   0x1   :  { %v14_v0 = vld [vmem:[%s159_s0 + $0x10] sm:$0xff]  ;;  %v12_v1 = vld [vmem:[%s159_s0] sm:$0xff]  ;;  %v15_v2 = vld [vmem:[%s159_s0 + $0x18] sm:$0xff] }
   0x2   :  { %v18_v3 = vmul.f32 %v14_v0, %v14_v0  ;;  %v16_v4 = vmul.f32 %v12_v1, %v12_v1  ;;  %v19_v5 = vmul.f32 %v15_v2, %v15_v2  ;;  %v13_v6 = vld [vmem:[%s159_s0 + $0x8] sm:$0xff] }
   0x3   :  { %7 = vsyncpa [#allocation3], 0  ;;  %v17_v7 = vmul.f32 %v13_v6, %v13_v6  ;;  %v81_v25 = vld [vmem:[%s160_s1] ss:$0 sm:$0xff]  ;;  %s115_s18 = smov [#allocation2]  }
   0x4   :  { %v27_v8 = vsel %vm20_vm0, %v18_v3, 0.0  ;;  %v21_v9 = vsel %vm20_vm0, %v16_v4, 0.0  ;;  %v30_v10 = vsel %vm20_vm0, %v19_v5, 0.0  ;;  %s70_s19 = sshll.u32 %s115_s18, 4  ;;  %s71_s19 = int_to_ptr.vmem [resolvable:$true] %s70_s19 }
   0x5   :  { %28 = vadd.xlane.f32.xlu1 %v27_v8  ;;  %22 = vadd.xlane.f32.xlu0 %v21_v9  ;;  %v24_v11 = vsel %vm20_vm0, %v17_v7, 0.0  ;;  %s93_s1 = scalar_lea.vmem %s71_s19, 512  ;;  %p98_p1 = scmp.lt.s32.totalorder %s71_s19, %s71_s19 }
   0x6   :  { %p94_p0 = scmp.ne.s32.totalorder %s71_s19, %s93_s1  ;;  %p99_p2 = scmp.lt.s32.totalorder %s93_s1, %s93_s1 }
   0x8   :  { %p100_p3 = por %p99_p2, %p98_p1 }
   0x9   :  { %31 = vadd.xlane.f32.xlu1 %v30_v10  ;;  %25 = vadd.xlane.f32.xlu0 %v24_v11 }
   0xa   :  { %p101_p4 = pnand %p100_p3, %p94_p0 }
  0x8e   :  { %v29_v12 = vpop.xlane.xlu1 %28  ;;  %v23_v13 = vpop.xlane.xlu0 %22 }
  0x8f   :  { %v36_v14 = vmul.f32 0.03125, %v29_v12  ;;  %v34_v15 = vmul.f32 0.03125, %v23_v13 }
  0x91   :  { %v40_v16 = vadd.f32 1e-06, %v36_v14  ;;  %v38_v17 = vadd.f32 1e-06, %v34_v15 }
  0x92   :  { %v32_v18 = vpop.xlane.xlu1 %31  ;;  %v26_v19 = vpop.xlane.xlu0 %25 }
  0x93   :  { %85 = vrsqrt.f32 %v40_v16  ;;  %v37_v20 = vmul.f32 0.03125, %v32_v18  ;;  %v35_v21 = vmul.f32 0.03125, %v26_v19 }
  0x94   :  { %87 = vrsqrt.f32 %v38_v17 }
  0x95   :  { %v41_v22 = vadd.f32 1e-06, %v37_v20  ;;  %v39_v23 = vadd.f32 1e-06, %v35_v21 }
  0x97   :  { %89 = vrsqrt.f32 %v41_v22 }
  0x98   :  { %91 = vrsqrt.f32 %v39_v23 }
  0xa0   :  { %v86_v24 = vpop.eup %85 }
  0xa1   :  { %v88_v26 = vpop.eup %87  ;;  %v48_v27 = vmul.f32 %v86_v24, %v14_v0 }
  0xa2   :  { %v46_v28 = vmul.f32 %v88_v26, %v12_v1 }
  0xa3   :  { %v59_v29 = vmul.f32 %v81_v25, %v48_v27 }
  0xa4   :  { %v90_v30 = vpop.eup %89  ;;  %v57_v31 = vmul.f32 %v81_v25, %v46_v28 }
  0xa5   :  { %v92_v32 = vpop.eup %91  ;;  %v49_v33 = vmul.f32 %v90_v30, %v15_v2  ;;  %63 = vst.msk [vmem:[#allocation2 + $0x10] sm:$0xff] %vm20_vm0, %v59_v29 }
  0xa6   :  { %v47_v34 = vmul.f32 %v92_v32, %v13_v6  ;;  %61 = vst.msk [vmem:[#allocation2] sm:$0xff] %vm20_vm0, %v57_v31 }
  0xa7   :  { %v60_v35 = vmul.f32 %v81_v25, %v49_v33 }
  0xa8   :  { %v58_v36 = vmul.f32 %v81_v25, %v47_v34 }
  0xa9   :  { %64 = vst.msk [vmem:[#allocation2 + $0x18] sm:$0xff] %vm20_vm0, %v60_v35 }
  0xaa   :  { %62 = vst.msk [vmem:[#allocation2 + $0x8] sm:$0xff] %vm20_vm0, %v58_v36 }
  0xab   :  { %104 = shalt.err (!%p101_p4)
}
  0xac   :  { %s116_s20 = smov 128   ;;  %s117_s21 = smov 8  }
  0xad   :  { %76 = dma.vmem_to_hbm [thread:$0]  %s71_s19, 512, %s161_s2, [#allocation3], %s116_s20, %s116_s20, %s117_s21  }
  0xae   :  { %113 = dma.done.wait [#allocation3], 512  }
  0xaf   :  { %114 = vsyncadd [#allocation3], 4294966784 }
  0xb0   :  { %80 = vsyncpa [#allocation3], 1 }

</bundles_post_ra>
